<compile_context>
chip_gen: v7x
topology: tpu7x:2x2x1
jax: 0.10.0
libtpu: 0.0.40
codegen_flags: <defaults>
</compile_context>

<pallas_src>
import numpy as np
import jax
import jax.numpy as jnp
from jax.experimental import pallas as pl
from jax.experimental.pallas import tpu as pltpu

OUT_LANES = 128  # lane-dense padded width of the head output


# ------------------------------------------------------------------ kernel

def qgnn_fused_kernel(h0_ref, we_ref, dstl_ref,
                      w1h_ref, w1w_ref, w2_ref, b2_ref,
                      wa_ref, ba_ref, wb_ref, bb_ref,
                      out_ref):
    """Fused forward: 5x QConv + relu-MLP head, everything VMEM-resident.

    h0   : [N, H]          f32   node features (embedding, zero-padded to H)
    we   : [E, 3]          f32   raw edge features [src_idx, dst_idx, reversed]
    dstl : [1, E]          i32   dst indices laid out on lanes
    w1h  : [5, H, inter]   bf16  linear1 h-part weights (layer 1 zero-padded)
    w1w  : [5, 3, inter]   f32   linear1 edge-part weights
    w2   : [5, H+inter, h] bf16  linear2 weights, stacked [h-part ; h_N-part]
    b2   : [5, 1, h]       f32   linear2 biases
    wa/ba, wb/bb : MLP head (wb/bb zero-padded to OUT_LANES columns)
    out  : [N, OUT_LANES]  f32
    """
    E = we_ref.shape[0]
    N, H = h0_ref.shape
    inter = w1h_ref.shape[2]
    L = w1h_ref.shape[0]

    we = we_ref[...]                                            # [E, 3] f32

    # --- one-hot gather / scatter matrices, built once from indices ---------
    src_col = we[:, 0:1].astype(jnp.int32)                      # [E, 1]
    s_eq = jax.lax.broadcasted_iota(jnp.int32, (E, N), 1) == src_col
    S = jnp.where(s_eq, 1.0, 0.0).astype(jnp.bfloat16)          # [E, N] exact 0/1
    d_eq = jax.lax.broadcasted_iota(jnp.int32, (N, E), 0) == dstl_ref[...]
    D_f32 = jnp.where(d_eq, 1.0, 0.0)                           # [N, E] exact 0/1
    Dt = D_f32.astype(jnp.bfloat16)
    # f32 inverse in-degree (exact mean; zero-in-degree rows of Dt are all-0
    # so h_N = 0 for those nodes, as in the original deployment).
    indeg = jnp.sum(D_f32, axis=1, keepdims=True)               # [N, 1]
    invdeg = 1.0 / jnp.maximum(indeg, 1.0)

    # hoisted lane-broadcasts of the 3 edge-feature columns (VPU edge bias)
    we_b = [jnp.broadcast_to(we[:, k:k + 1], (E, inter)) for k in range(3)]

    h = h0_ref[...].astype(jnp.bfloat16)                        # chained in bf16

    for l in range(L):
        w1h = w1h_ref[l]                                        # [H, inter] bf16
        w1w = w1w_ref[l]                                        # [3, inter] f32
        w2 = w2_ref[l]                                          # [H+inter, h] bf16
        b2 = b2_ref[l]                                          # [1, h] f32

        hw = jnp.dot(h, w1h, preferred_element_type=jnp.float32)     # [N, inter]
        # edge bias = w_edge @ w1w as 3 broadcast FMAs on the VPU (no K=3 MXU pass)
        eb = (we_b[0] * w1w[0:1, :] + we_b[1] * w1w[1:2, :]
              + we_b[2] * w1w[2:3, :])                                # [E, inter] f32
        # re-associated gather: S @ (h @ w1h) == (S @ h) @ w1h (exact, S one-hot)
        m = jnp.dot(S, hw.astype(jnp.bfloat16),
                    preferred_element_type=jnp.float32) + eb          # [E, inter]
        m = jnp.where(m > 0, m, 0.01 * m)                             # leaky_relu
        h_N = invdeg * jnp.dot(Dt, m.astype(jnp.bfloat16),
                               preferred_element_type=jnp.float32)    # [N, inter]
        # linear2 on concat([h, h_N]): one packed weight operand, two K-slices
        lin = (jnp.dot(h, w2[:H, :], preferred_element_type=jnp.float32)
               + jnp.dot(h_N.astype(jnp.bfloat16), w2[H:, :],
                         preferred_element_type=jnp.float32)
               + b2)
        h = jnp.maximum(lin, 0.0).astype(jnp.bfloat16)

    # MLP head: relu(h @ Wa + ba) @ Wb + bb  (Wb/bb padded -> lane-dense store)
    t = jnp.dot(h, wa_ref[...], preferred_element_type=jnp.float32) + ba_ref[...]
    t = jnp.maximum(t, 0.0).astype(jnp.bfloat16)
    out_ref[...] = (jnp.dot(t, wb_ref[...], preferred_element_type=jnp.float32)
                    + bb_ref[...])


# ------------------------------------------------------------------ wrapper

def qgnn_forward(gate_type, src, dst, reversed_flag, params):
    embedding, conv_params, wa, ba, wb, bb = params

    in_feats = embedding.shape[1]
    inter = conv_params[0][1].shape[1]
    h_feats = conv_params[0][3].shape[1]
    num_classes = wb.shape[1]
    N = gate_type.shape[0]
    E = src.shape[0]
    H = h_feats
    L = len(conv_params)
    assert num_classes <= OUT_LANES

    # glue (plain JAX): embedding lookup + zero-pad node features to width H
    h0 = embedding[gate_type]                                         # [N, in_feats]
    h0p = jnp.pad(h0, ((0, 0), (0, H - in_feats)))                    # [N, H]

    # raw edge features; per-layer [3, inter] edge weights applied in-kernel
    we = jnp.stack([src.astype(jnp.float32), dst.astype(jnp.float32),
                    reversed_flag.astype(jnp.float32)], axis=1)       # [E, 3]
    dstl = dst.astype(jnp.int32).reshape(1, E)                        # [1, E]

    # pad layer-1 (Fin = in_feats) weights to Fin = H so all 5 layers stack
    def pad_layer(p, fin):
        w1h, w1w, w2, b2 = p
        w1h_p = jnp.zeros((H, inter), jnp.float32).at[:fin, :].set(w1h)
        w2_p = jnp.zeros((H + inter, h_feats), jnp.float32)
        w2_p = w2_p.at[:fin, :].set(w2[:fin]).at[H:, :].set(w2[fin:])
        return w1h_p, w1w, w2_p, b2

    fins = [in_feats] + [h_feats] * (L - 1)
    padded = [pad_layer(p, f) for p, f in zip(conv_params, fins)]
    w1h_s = jnp.stack([p[0] for p in padded]).astype(jnp.bfloat16)    # [L,H,inter]
    w1w_s = jnp.stack([p[1] for p in padded])                         # [L,3,inter]
    w2_s = jnp.stack([p[2] for p in padded]).astype(jnp.bfloat16)     # [L,H+inter,h]
    b2_s = jnp.stack([p[3] for p in padded])                          # [L,1,h]

    # lane-dense head output: pad Wb/bb columns to OUT_LANES, slice after
    wb_p = jnp.pad(wb, ((0, 0), (0, OUT_LANES - num_classes))).astype(jnp.bfloat16)
    bb_p = jnp.pad(bb, ((0, 0), (0, OUT_LANES - num_classes)))

    args = (h0p, we, dstl, w1h_s, w1w_s, w2_s, b2_s,
            wa.astype(jnp.bfloat16), ba, wb_p, bb_p)

    # advisory cost estimate for the XLA scheduler
    flops = L * 2 * (N * H * inter + E * N * inter + N * E * inter
                     + N * H * h_feats + N * inter * h_feats)
    flops += 2 * (N * h_feats * h_feats + N * h_feats * OUT_LANES)
    bytes_accessed = sum(int(np.prod(a.shape)) * a.dtype.itemsize for a in args)
    bytes_accessed += N * OUT_LANES * 4

    out_p = pl.pallas_call(
        qgnn_fused_kernel,
        out_shape=jax.ShapeDtypeStruct((N, OUT_LANES), jnp.float32),
        in_specs=[pl.BlockSpec(memory_space=pltpu.MemorySpace.VMEM)] * len(args),
        out_specs=pl.BlockSpec(memory_space=pltpu.MemorySpace.VMEM),
        compiler_params=pltpu.CompilerParams(vmem_limit_bytes=32 * 1024 * 1024),
        cost_estimate=pl.CostEstimate(flops=flops, transcendentals=0,
                                      bytes_accessed=bytes_accessed),
    )(*args)
    return out_p[:, :num_classes]


# ------------------------------------------------------------------ params

def xavier_normal(key, out_f, in_f, gain):
    std = gain * np.sqrt(2.0 / (in_f + out_f))
    return std * jax.random.normal(key, (out_f, in_f), dtype=jnp.float32)


def make_qconv_params(key, in_feat, inter_dim, out_feat):
    gain = np.sqrt(2.0)  # calculate_gain('relu')
    k1, k2, k3 = jax.random.split(key, 3)
    w1 = xavier_normal(k1, inter_dim, in_feat + 3, gain)          # [inter, in+3], no bias
    w2 = xavier_normal(k2, out_feat, in_feat + inter_dim, gain)   # [out, in+inter]
    b2 = 0.01 * jax.random.normal(k3, (1, out_feat), dtype=jnp.float32)
    w1t = jnp.transpose(w1)                                       # [in+3, inter]
    w1h = w1t[:in_feat]                                           # [in, inter]
    w1w = w1t[in_feat:]                                           # [3, inter]
    w2t = jnp.transpose(w2)                                       # [in+inter, out]
    return (w1h, w1w, w2t, b2)


# ------------------------------------------------------------------ main

if __name__ == "__main__":
    # small, deterministic problem sizes (module dims: in=8, h=32, C=4, inter=16)
    in_feats, h_feats, num_classes, inter_dim = 8, 32, 4, 16
    N, E = 16, 32

    key = jax.random.PRNGKey(0)
    keys = jax.random.split(key, 9)
    k_gate, k_emb, k_b1, k_b2 = keys[0], keys[1], keys[2], keys[3]
    k_convs = keys[4:]          # exactly 5 conv layers

    # synthetic deterministic graph
    gate_type = jax.random.randint(k_gate, (N,), 0, in_feats, dtype=jnp.int32)
    src_np = np.arange(E) % N
    dst_np = (7 * np.arange(E) + 3) % N
    rev_np = (np.arange(E) % 2).astype(np.float32)
    src = jnp.asarray(src_np, dtype=jnp.int32)
    dst = jnp.asarray(dst_np, dtype=jnp.int32)
    rev = jnp.asarray(rev_np)

    # parameters (deterministic xavier_normal init with relu gain, as in module)
    embedding = jax.random.normal(k_emb, (in_feats, in_feats), dtype=jnp.float32)
    conv_params = []
    feat_in = in_feats
    for kc in k_convs:
        conv_params.append(make_qconv_params(kc, feat_in, inter_dim, h_feats))
        feat_in = h_feats
    gain = np.sqrt(2.0)
    wa = jnp.transpose(xavier_normal(k_b1, h_feats, h_feats, gain))        # [h, h]
    ba = jnp.zeros((1, h_feats), dtype=jnp.float32)
    wb = jnp.transpose(xavier_normal(k_b2, num_classes, h_feats, gain))    # [h, C]
    bb = jnp.zeros((1, num_classes), dtype=jnp.float32)

    params = (embedding, conv_params, wa, ba, wb, bb)

    out = qgnn_forward(gate_type, src, dst, rev, params)
    out = jax.block_until_ready(out)
    assert out.shape == (N, num_classes), out.shape
    assert np.isfinite(np.asarray(out)).all()
    print("KERNEL_OK")
</pallas_src>

<mosaic_0001>
module attributes {stable_mosaic.version = 11 : i64} {
  func.func @qgnn_fused_kernel(%arg0: memref<16x32xf32, #tpu.memory_space<vmem>>, %arg1: memref<32x3xf32, #tpu.memory_space<vmem>>, %arg2: memref<1x32xi32, #tpu.memory_space<vmem>>, %arg3: memref<5x32x16xbf16, #tpu.memory_space<vmem>>, %arg4: memref<5x3x16xf32, #tpu.memory_space<vmem>>, %arg5: memref<5x48x32xbf16, #tpu.memory_space<vmem>>, %arg6: memref<5x1x32xf32, #tpu.memory_space<vmem>>, %arg7: memref<32x32xbf16, #tpu.memory_space<vmem>>, %arg8: memref<1x32xf32, #tpu.memory_space<vmem>>, %arg9: memref<32x128xbf16, #tpu.memory_space<vmem>>, %arg10: memref<1x128xf32, #tpu.memory_space<vmem>>, %arg11: memref<16x128xf32, #tpu.memory_space<vmem>>) attributes {dimension_semantics = [], scalar_prefetch = 0 : i64, scratch_operands = 0 : i64, tpu.core_type = #tpu.core_type<tc>} {
    %c0 = arith.constant 0 : index
    %c0_0 = arith.constant 0 : index
    %0 = vector.load %arg1[%c0, %c0_0] : memref<32x3xf32, #tpu.memory_space<vmem>>, vector<32x3xf32>
    %1 = vector.extract_strided_slice %0 {offsets = [0, 0], sizes = [32, 1], strides = [1, 1]} : vector<32x3xf32> to vector<32x1xf32>
    %2 = arith.fptosi %1 : vector<32x1xf32> to vector<32x1xi32>
    %3 = tpu.iota {dimensions = array<i32: 1>} : vector<32x16xi32>
    %4 = vector.broadcast %2 : vector<32x1xi32> to vector<32x16xi32>
    %5 = arith.cmpi eq, %3, %4 : vector<32x16xi32>
    %cst = arith.constant 1.000000e+00 : f32
    %cst_1 = arith.constant 0.000000e+00 : f32
    %6 = vector.broadcast %cst : f32 to vector<32x16xf32>
    %7 = vector.broadcast %cst_1 : f32 to vector<32x16xf32>
    %8 = arith.select %5, %6, %7 : vector<32x16xi1>, vector<32x16xf32>
    %9 = arith.truncf %8 : vector<32x16xf32> to vector<32x16xbf16>
    %10 = tpu.iota {dimensions = array<i32: 0>} : vector<16x32xi32>
    %c0_2 = arith.constant 0 : index
    %c0_3 = arith.constant 0 : index
    %11 = vector.load %arg2[%c0_2, %c0_3] : memref<1x32xi32, #tpu.memory_space<vmem>>, vector<1x32xi32>
    %12 = vector.broadcast %11 : vector<1x32xi32> to vector<16x32xi32>
    %13 = arith.cmpi eq, %10, %12 : vector<16x32xi32>
    %cst_4 = arith.constant 1.000000e+00 : f32
    %cst_5 = arith.constant 0.000000e+00 : f32
    %14 = vector.broadcast %cst_4 : f32 to vector<16x32xf32>
    %15 = vector.broadcast %cst_5 : f32 to vector<16x32xf32>
    %16 = arith.select %13, %14, %15 : vector<16x32xi1>, vector<16x32xf32>
    %17 = arith.truncf %16 : vector<16x32xf32> to vector<16x32xbf16>
    %cst_6 = arith.constant dense<0.000000e+00> : vector<16xf32>
    %18 = vector.multi_reduction <add>, %16, %cst_6 [1] : vector<16x32xf32> to vector<16xf32>
    %19 = vector.shape_cast %18 : vector<16xf32> to vector<16x1xf32>
    %cst_7 = arith.constant 1.000000e+00 : f32
    %20 = vector.broadcast %cst_7 : f32 to vector<16x1xf32>
    %21 = arith.maximumf %19, %20 : vector<16x1xf32>
    %cst_8 = arith.constant 1.000000e+00 : f32
    %22 = vector.broadcast %cst_8 : f32 to vector<16x1xf32>
    %23 = arith.divf %22, %21 : vector<16x1xf32>
    %24 = vector.extract_strided_slice %0 {offsets = [0, 0], sizes = [32, 1], strides = [1, 1]} : vector<32x3xf32> to vector<32x1xf32>
    %25 = vector.shape_cast %24 : vector<32x1xf32> to vector<32x1xf32>
    %26 = vector.broadcast %25 : vector<32x1xf32> to vector<32x16xf32>
    %27 = vector.extract_strided_slice %0 {offsets = [0, 1], sizes = [32, 1], strides = [1, 1]} : vector<32x3xf32> to vector<32x1xf32>
    %28 = vector.shape_cast %27 : vector<32x1xf32> to vector<32x1xf32>
    %29 = vector.broadcast %28 : vector<32x1xf32> to vector<32x16xf32>
    %30 = vector.extract_strided_slice %0 {offsets = [0, 2], sizes = [32, 1], strides = [1, 1]} : vector<32x3xf32> to vector<32x1xf32>
    %31 = vector.shape_cast %30 : vector<32x1xf32> to vector<32x1xf32>
    %32 = vector.broadcast %31 : vector<32x1xf32> to vector<32x16xf32>
    %c0_9 = arith.constant 0 : index
    %c0_10 = arith.constant 0 : index
    %33 = vector.load %arg0[%c0_9, %c0_10] : memref<16x32xf32, #tpu.memory_space<vmem>>, vector<16x32xf32>
    %34 = arith.truncf %33 : vector<16x32xf32> to vector<16x32xbf16>
    %c0_11 = arith.constant 0 : index
    %c0_12 = arith.constant 0 : index
    %c0_13 = arith.constant 0 : index
    %35 = vector.load %arg3[%c0_11, %c0_12, %c0_13] : memref<5x32x16xbf16, #tpu.memory_space<vmem>>, vector<1x32x16xbf16>
    %36 = vector.shape_cast %35 : vector<1x32x16xbf16> to vector<32x16xbf16>
    %c0_14 = arith.constant 0 : index
    %c0_15 = arith.constant 0 : index
    %c0_16 = arith.constant 0 : index
    %37 = vector.load %arg4[%c0_14, %c0_15, %c0_16] : memref<5x3x16xf32, #tpu.memory_space<vmem>>, vector<1x3x16xf32>
    %38 = vector.shape_cast %37 : vector<1x3x16xf32> to vector<3x16xf32>
    %c0_17 = arith.constant 0 : index
    %c0_18 = arith.constant 0 : index
    %c0_19 = arith.constant 0 : index
    %39 = vector.load %arg5[%c0_17, %c0_18, %c0_19] : memref<5x48x32xbf16, #tpu.memory_space<vmem>>, vector<1x48x32xbf16>
    %40 = vector.shape_cast %39 : vector<1x48x32xbf16> to vector<48x32xbf16>
    %c0_20 = arith.constant 0 : index
    %c0_21 = arith.constant 0 : index
    %c0_22 = arith.constant 0 : index
    %41 = vector.load %arg6[%c0_20, %c0_21, %c0_22] : memref<5x1x32xf32, #tpu.memory_space<vmem>>, vector<1x1x32xf32>
    %42 = vector.shape_cast %41 : vector<1x1x32xf32> to vector<1x32xf32>
    %cst_23 = arith.constant dense<0.000000e+00> : vector<16x16xf32>
    %43 = tpu.matmul %34, %36, %cst_23 {dimension_numbers = #tpu.dot_dimension_numbers<[1], [0], [0], [1], [0, 0, 1, 1], [], []>} : vector<16x32xbf16>, vector<32x16xbf16>, vector<16x16xf32> -> vector<16x16xf32>
    %44 = vector.extract_strided_slice %38 {offsets = [0, 0], sizes = [1, 16], strides = [1, 1]} : vector<3x16xf32> to vector<1x16xf32>
    %45 = vector.broadcast %44 : vector<1x16xf32> to vector<32x16xf32>
    %46 = arith.mulf %26, %45 : vector<32x16xf32>
    %47 = vector.extract_strided_slice %38 {offsets = [1, 0], sizes = [1, 16], strides = [1, 1]} : vector<3x16xf32> to vector<1x16xf32>
    %48 = vector.broadcast %47 : vector<1x16xf32> to vector<32x16xf32>
    %49 = arith.mulf %29, %48 : vector<32x16xf32>
    %50 = arith.addf %46, %49 : vector<32x16xf32>
    %51 = vector.extract_strided_slice %38 {offsets = [2, 0], sizes = [1, 16], strides = [1, 1]} : vector<3x16xf32> to vector<1x16xf32>
    %52 = vector.broadcast %51 : vector<1x16xf32> to vector<32x16xf32>
    %53 = arith.mulf %32, %52 : vector<32x16xf32>
    %54 = arith.addf %50, %53 : vector<32x16xf32>
    %55 = arith.truncf %43 : vector<16x16xf32> to vector<16x16xbf16>
    %cst_24 = arith.constant dense<0.000000e+00> : vector<32x16xf32>
    %56 = tpu.matmul %9, %55, %cst_24 {dimension_numbers = #tpu.dot_dimension_numbers<[1], [0], [0], [1], [0, 0, 1, 1], [], []>} : vector<32x16xbf16>, vector<16x16xbf16>, vector<32x16xf32> -> vector<32x16xf32>
    %57 = arith.addf %56, %54 : vector<32x16xf32>
    %cst_25 = arith.constant 0.000000e+00 : f32
    %58 = vector.broadcast %cst_25 : f32 to vector<32x16xf32>
    %59 = arith.cmpf ogt, %57, %58 : vector<32x16xf32>
    %cst_26 = arith.constant 0.00999999977 : f32
    %60 = vector.broadcast %cst_26 : f32 to vector<32x16xf32>
    %61 = arith.mulf %60, %57 : vector<32x16xf32>
    %62 = arith.select %59, %57, %61 : vector<32x16xi1>, vector<32x16xf32>
    %63 = arith.truncf %62 : vector<32x16xf32> to vector<32x16xbf16>
    %cst_27 = arith.constant dense<0.000000e+00> : vector<16x16xf32>
    %64 = tpu.matmul %17, %63, %cst_27 {dimension_numbers = #tpu.dot_dimension_numbers<[1], [0], [0], [1], [0, 0, 1, 1], [], []>} : vector<16x32xbf16>, vector<32x16xbf16>, vector<16x16xf32> -> vector<16x16xf32>
    %65 = vector.broadcast %23 : vector<16x1xf32> to vector<16x16xf32>
    %66 = arith.mulf %65, %64 : vector<16x16xf32>
    %67 = vector.extract_strided_slice %40 {offsets = [0, 0], sizes = [32, 32], strides = [1, 1]} : vector<48x32xbf16> to vector<32x32xbf16>
    %cst_28 = arith.constant dense<0.000000e+00> : vector<16x32xf32>
    %68 = tpu.matmul %34, %67, %cst_28 {dimension_numbers = #tpu.dot_dimension_numbers<[1], [0], [0], [1], [0, 0, 1, 1], [], []>} : vector<16x32xbf16>, vector<32x32xbf16>, vector<16x32xf32> -> vector<16x32xf32>
    %69 = arith.truncf %66 : vector<16x16xf32> to vector<16x16xbf16>
    %70 = vector.extract_strided_slice %40 {offsets = [32, 0], sizes = [16, 32], strides = [1, 1]} : vector<48x32xbf16> to vector<16x32xbf16>
    %cst_29 = arith.constant dense<0.000000e+00> : vector<16x32xf32>
    %71 = tpu.matmul %69, %70, %cst_29 {dimension_numbers = #tpu.dot_dimension_numbers<[1], [0], [0], [1], [0, 0, 1, 1], [], []>} : vector<16x16xbf16>, vector<16x32xbf16>, vector<16x32xf32> -> vector<16x32xf32>
    %72 = arith.addf %68, %71 : vector<16x32xf32>
    %73 = vector.broadcast %42 : vector<1x32xf32> to vector<16x32xf32>
    %74 = arith.addf %72, %73 : vector<16x32xf32>
    %cst_30 = arith.constant 0.000000e+00 : f32
    %75 = vector.broadcast %cst_30 : f32 to vector<16x32xf32>
    %76 = arith.maximumf %74, %75 : vector<16x32xf32>
    %77 = arith.truncf %76 : vector<16x32xf32> to vector<16x32xbf16>
    %c1 = arith.constant 1 : index
    %c0_31 = arith.constant 0 : index
    %c0_32 = arith.constant 0 : index
    %78 = vector.load %arg3[%c1, %c0_31, %c0_32] : memref<5x32x16xbf16, #tpu.memory_space<vmem>>, vector<1x32x16xbf16>
    %79 = vector.shape_cast %78 : vector<1x32x16xbf16> to vector<32x16xbf16>
    %c1_33 = arith.constant 1 : index
    %c0_34 = arith.constant 0 : index
    %c0_35 = arith.constant 0 : index
    %80 = vector.load %arg4[%c1_33, %c0_34, %c0_35] : memref<5x3x16xf32, #tpu.memory_space<vmem>>, vector<1x3x16xf32>
    %81 = vector.shape_cast %80 : vector<1x3x16xf32> to vector<3x16xf32>
    %c1_36 = arith.constant 1 : index
    %c0_37 = arith.constant 0 : index
    %c0_38 = arith.constant 0 : index
    %82 = vector.load %arg5[%c1_36, %c0_37, %c0_38] : memref<5x48x32xbf16, #tpu.memory_space<vmem>>, vector<1x48x32xbf16>
    %83 = vector.shape_cast %82 : vector<1x48x32xbf16> to vector<48x32xbf16>
    %c1_39 = arith.constant 1 : index
    %c0_40 = arith.constant 0 : index
    %c0_41 = arith.constant 0 : index
    %84 = vector.load %arg6[%c1_39, %c0_40, %c0_41] : memref<5x1x32xf32, #tpu.memory_space<vmem>>, vector<1x1x32xf32>
    %85 = vector.shape_cast %84 : vector<1x1x32xf32> to vector<1x32xf32>
    %cst_42 = arith.constant dense<0.000000e+00> : vector<16x16xf32>
    %86 = tpu.matmul %77, %79, %cst_42 {dimension_numbers = #tpu.dot_dimension_numbers<[1], [0], [0], [1], [0, 0, 1, 1], [], []>} : vector<16x32xbf16>, vector<32x16xbf16>, vector<16x16xf32> -> vector<16x16xf32>
    %87 = vector.extract_strided_slice %81 {offsets = [0, 0], sizes = [1, 16], strides = [1, 1]} : vector<3x16xf32> to vector<1x16xf32>
    %88 = vector.broadcast %87 : vector<1x16xf32> to vector<32x16xf32>
    %89 = arith.mulf %26, %88 : vector<32x16xf32>
    %90 = vector.extract_strided_slice %81 {offsets = [1, 0], sizes = [1, 16], strides = [1, 1]} : vector<3x16xf32> to vector<1x16xf32>
    %91 = vector.broadcast %90 : vector<1x16xf32> to vector<32x16xf32>
    %92 = arith.mulf %29, %91 : vector<32x16xf32>
    %93 = arith.addf %89, %92 : vector<32x16xf32>
    %94 = vector.extract_strided_slice %81 {offsets = [2, 0], sizes = [1, 16], strides = [1, 1]} : vector<3x16xf32> to vector<1x16xf32>
    %95 = vector.broadcast %94 : vector<1x16xf32> to vector<32x16xf32>
    %96 = arith.mulf %32, %95 : vector<32x16xf32>
    %97 = arith.addf %93, %96 : vector<32x16xf32>
    %98 = arith.truncf %86 : vector<16x16xf32> to vector<16x16xbf16>
    %cst_43 = arith.constant dense<0.000000e+00> : vector<32x16xf32>
    %99 = tpu.matmul %9, %98, %cst_43 {dimension_numbers = #tpu.dot_dimension_numbers<[1], [0], [0], [1], [0, 0, 1, 1], [], []>} : vector<32x16xbf16>, vector<16x16xbf16>, vector<32x16xf32> -> vector<32x16xf32>
    %100 = arith.addf %99, %97 : vector<32x16xf32>
    %cst_44 = arith.constant 0.000000e+00 : f32
    %101 = vector.broadcast %cst_44 : f32 to vector<32x16xf32>
    %102 = arith.cmpf ogt, %100, %101 : vector<32x16xf32>
    %cst_45 = arith.constant 0.00999999977 : f32
    %103 = vector.broadcast %cst_45 : f32 to vector<32x16xf32>
    %104 = arith.mulf %103, %100 : vector<32x16xf32>
    %105 = arith.select %102, %100, %104 : vector<32x16xi1>, vector<32x16xf32>
    %106 = arith.truncf %105 : vector<32x16xf32> to vector<32x16xbf16>
    %cst_46 = arith.constant dense<0.000000e+00> : vector<16x16xf32>
    %107 = tpu.matmul %17, %106, %cst_46 {dimension_numbers = #tpu.dot_dimension_numbers<[1], [0], [0], [1], [0, 0, 1, 1], [], []>} : vector<16x32xbf16>, vector<32x16xbf16>, vector<16x16xf32> -> vector<16x16xf32>
    %108 = vector.broadcast %23 : vector<16x1xf32> to vector<16x16xf32>
    %109 = arith.mulf %108, %107 : vector<16x16xf32>
    %110 = vector.extract_strided_slice %83 {offsets = [0, 0], sizes = [32, 32], strides = [1, 1]} : vector<48x32xbf16> to vector<32x32xbf16>
    %cst_47 = arith.constant dense<0.000000e+00> : vector<16x32xf32>
    %111 = tpu.matmul %77, %110, %cst_47 {dimension_numbers = #tpu.dot_dimension_numbers<[1], [0], [0], [1], [0, 0, 1, 1], [], []>} : vector<16x32xbf16>, vector<32x32xbf16>, vector<16x32xf32> -> vector<16x32xf32>
    %112 = arith.truncf %109 : vector<16x16xf32> to vector<16x16xbf16>
    %113 = vector.extract_strided_slice %83 {offsets = [32, 0], sizes = [16, 32], strides = [1, 1]} : vector<48x32xbf16> to vector<16x32xbf16>
    %cst_48 = arith.constant dense<0.000000e+00> : vector<16x32xf32>
    %114 = tpu.matmul %112, %113, %cst_48 {dimension_numbers = #tpu.dot_dimension_numbers<[1], [0], [0], [1], [0, 0, 1, 1], [], []>} : vector<16x16xbf16>, vector<16x32xbf16>, vector<16x32xf32> -> vector<16x32xf32>
    %115 = arith.addf %111, %114 : vector<16x32xf32>
    %116 = vector.broadcast %85 : vector<1x32xf32> to vector<16x32xf32>
    %117 = arith.addf %115, %116 : vector<16x32xf32>
    %cst_49 = arith.constant 0.000000e+00 : f32
    %118 = vector.broadcast %cst_49 : f32 to vector<16x32xf32>
    %119 = arith.maximumf %117, %118 : vector<16x32xf32>
    %120 = arith.truncf %119 : vector<16x32xf32> to vector<16x32xbf16>
    %c2 = arith.constant 2 : index
    %c0_50 = arith.constant 0 : index
    %c0_51 = arith.constant 0 : index
    %121 = vector.load %arg3[%c2, %c0_50, %c0_51] : memref<5x32x16xbf16, #tpu.memory_space<vmem>>, vector<1x32x16xbf16>
    %122 = vector.shape_cast %121 : vector<1x32x16xbf16> to vector<32x16xbf16>
    %c2_52 = arith.constant 2 : index
    %c0_53 = arith.constant 0 : index
    %c0_54 = arith.constant 0 : index
    %123 = vector.load %arg4[%c2_52, %c0_53, %c0_54] : memref<5x3x16xf32, #tpu.memory_space<vmem>>, vector<1x3x16xf32>
    %124 = vector.shape_cast %123 : vector<1x3x16xf32> to vector<3x16xf32>
    %c2_55 = arith.constant 2 : index
    %c0_56 = arith.constant 0 : index
    %c0_57 = arith.constant 0 : index
    %125 = vector.load %arg5[%c2_55, %c0_56, %c0_57] : memref<5x48x32xbf16, #tpu.memory_space<vmem>>, vector<1x48x32xbf16>
    %126 = vector.shape_cast %125 : vector<1x48x32xbf16> to vector<48x32xbf16>
    %c2_58 = arith.constant 2 : index
    %c0_59 = arith.constant 0 : index
    %c0_60 = arith.constant 0 : index
    %127 = vector.load %arg6[%c2_58, %c0_59, %c0_60] : memref<5x1x32xf32, #tpu.memory_space<vmem>>, vector<1x1x32xf32>
    %128 = vector.shape_cast %127 : vector<1x1x32xf32> to vector<1x32xf32>
    %cst_61 = arith.constant dense<0.000000e+00> : vector<16x16xf32>
    %129 = tpu.matmul %120, %122, %cst_61 {dimension_numbers = #tpu.dot_dimension_numbers<[1], [0], [0], [1], [0, 0, 1, 1], [], []>} : vector<16x32xbf16>, vector<32x16xbf16>, vector<16x16xf32> -> vector<16x16xf32>
    %130 = vector.extract_strided_slice %124 {offsets = [0, 0], sizes = [1, 16], strides = [1, 1]} : vector<3x16xf32> to vector<1x16xf32>
    %131 = vector.broadcast %130 : vector<1x16xf32> to vector<32x16xf32>
    %132 = arith.mulf %26, %131 : vector<32x16xf32>
    %133 = vector.extract_strided_slice %124 {offsets = [1, 0], sizes = [1, 16], strides = [1, 1]} : vector<3x16xf32> to vector<1x16xf32>
    %134 = vector.broadcast %133 : vector<1x16xf32> to vector<32x16xf32>
    %135 = arith.mulf %29, %134 : vector<32x16xf32>
    %136 = arith.addf %132, %135 : vector<32x16xf32>
    %137 = vector.extract_strided_slice %124 {offsets = [2, 0], sizes = [1, 16], strides = [1, 1]} : vector<3x16xf32> to vector<1x16xf32>
    %138 = vector.broadcast %137 : vector<1x16xf32> to vector<32x16xf32>
    %139 = arith.mulf %32, %138 : vector<32x16xf32>
    %140 = arith.addf %136, %139 : vector<32x16xf32>
    %141 = arith.truncf %129 : vector<16x16xf32> to vector<16x16xbf16>
    %cst_62 = arith.constant dense<0.000000e+00> : vector<32x16xf32>
    %142 = tpu.matmul %9, %141, %cst_62 {dimension_numbers = #tpu.dot_dimension_numbers<[1], [0], [0], [1], [0, 0, 1, 1], [], []>} : vector<32x16xbf16>, vector<16x16xbf16>, vector<32x16xf32> -> vector<32x16xf32>
    %143 = arith.addf %142, %140 : vector<32x16xf32>
    %cst_63 = arith.constant 0.000000e+00 : f32
    %144 = vector.broadcast %cst_63 : f32 to vector<32x16xf32>
    %145 = arith.cmpf ogt, %143, %144 : vector<32x16xf32>
    %cst_64 = arith.constant 0.00999999977 : f32
    %146 = vector.broadcast %cst_64 : f32 to vector<32x16xf32>
    %147 = arith.mulf %146, %143 : vector<32x16xf32>
    %148 = arith.select %145, %143, %147 : vector<32x16xi1>, vector<32x16xf32>
    %149 = arith.truncf %148 : vector<32x16xf32> to vector<32x16xbf16>
    %cst_65 = arith.constant dense<0.000000e+00> : vector<16x16xf32>
    %150 = tpu.matmul %17, %149, %cst_65 {dimension_numbers = #tpu.dot_dimension_numbers<[1], [0], [0], [1], [0, 0, 1, 1], [], []>} : vector<16x32xbf16>, vector<32x16xbf16>, vector<16x16xf32> -> vector<16x16xf32>
    %151 = vector.broadcast %23 : vector<16x1xf32> to vector<16x16xf32>
    %152 = arith.mulf %151, %150 : vector<16x16xf32>
    %153 = vector.extract_strided_slice %126 {offsets = [0, 0], sizes = [32, 32], strides = [1, 1]} : vector<48x32xbf16> to vector<32x32xbf16>
    %cst_66 = arith.constant dense<0.000000e+00> : vector<16x32xf32>
    %154 = tpu.matmul %120, %153, %cst_66 {dimension_numbers = #tpu.dot_dimension_numbers<[1], [0], [0], [1], [0, 0, 1, 1], [], []>} : vector<16x32xbf16>, vector<32x32xbf16>, vector<16x32xf32> -> vector<16x32xf32>
    %155 = arith.truncf %152 : vector<16x16xf32> to vector<16x16xbf16>
    %156 = vector.extract_strided_slice %126 {offsets = [32, 0], sizes = [16, 32], strides = [1, 1]} : vector<48x32xbf16> to vector<16x32xbf16>
    %cst_67 = arith.constant dense<0.000000e+00> : vector<16x32xf32>
    %157 = tpu.matmul %155, %156, %cst_67 {dimension_numbers = #tpu.dot_dimension_numbers<[1], [0], [0], [1], [0, 0, 1, 1], [], []>} : vector<16x16xbf16>, vector<16x32xbf16>, vector<16x32xf32> -> vector<16x32xf32>
    %158 = arith.addf %154, %157 : vector<16x32xf32>
    %159 = vector.broadcast %128 : vector<1x32xf32> to vector<16x32xf32>
    %160 = arith.addf %158, %159 : vector<16x32xf32>
    %cst_68 = arith.constant 0.000000e+00 : f32
    %161 = vector.broadcast %cst_68 : f32 to vector<16x32xf32>
    %162 = arith.maximumf %160, %161 : vector<16x32xf32>
    %163 = arith.truncf %162 : vector<16x32xf32> to vector<16x32xbf16>
    %c3 = arith.constant 3 : index
    %c0_69 = arith.constant 0 : index
    %c0_70 = arith.constant 0 : index
    %164 = vector.load %arg3[%c3, %c0_69, %c0_70] : memref<5x32x16xbf16, #tpu.memory_space<vmem>>, vector<1x32x16xbf16>
    %165 = vector.shape_cast %164 : vector<1x32x16xbf16> to vector<32x16xbf16>
    %c3_71 = arith.constant 3 : index
    %c0_72 = arith.constant 0 : index
    %c0_73 = arith.constant 0 : index
    %166 = vector.load %arg4[%c3_71, %c0_72, %c0_73] : memref<5x3x16xf32, #tpu.memory_space<vmem>>, vector<1x3x16xf32>
    %167 = vector.shape_cast %166 : vector<1x3x16xf32> to vector<3x16xf32>
    %c3_74 = arith.constant 3 : index
    %c0_75 = arith.constant 0 : index
    %c0_76 = arith.constant 0 : index
    %168 = vector.load %arg5[%c3_74, %c0_75, %c0_76] : memref<5x48x32xbf16, #tpu.memory_space<vmem>>, vector<1x48x32xbf16>
    %169 = vector.shape_cast %168 : vector<1x48x32xbf16> to vector<48x32xbf16>
    %c3_77 = arith.constant 3 : index
    %c0_78 = arith.constant 0 : index
    %c0_79 = arith.constant 0 : index
    %170 = vector.load %arg6[%c3_77, %c0_78, %c0_79] : memref<5x1x32xf32, #tpu.memory_space<vmem>>, vector<1x1x32xf32>
    %171 = vector.shape_cast %170 : vector<1x1x32xf32> to vector<1x32xf32>
    %cst_80 = arith.constant dense<0.000000e+00> : vector<16x16xf32>
    %172 = tpu.matmul %163, %165, %cst_80 {dimension_numbers = #tpu.dot_dimension_numbers<[1], [0], [0], [1], [0, 0, 1, 1], [], []>} : vector<16x32xbf16>, vector<32x16xbf16>, vector<16x16xf32> -> vector<16x16xf32>
    %173 = vector.extract_strided_slice %167 {offsets = [0, 0], sizes = [1, 16], strides = [1, 1]} : vector<3x16xf32> to vector<1x16xf32>
    %174 = vector.broadcast %173 : vector<1x16xf32> to vector<32x16xf32>
    %175 = arith.mulf %26, %174 : vector<32x16xf32>
    %176 = vector.extract_strided_slice %167 {offsets = [1, 0], sizes = [1, 16], strides = [1, 1]} : vector<3x16xf32> to vector<1x16xf32>
    %177 = vector.broadcast %176 : vector<1x16xf32> to vector<32x16xf32>
    %178 = arith.mulf %29, %177 : vector<32x16xf32>
    %179 = arith.addf %175, %178 : vector<32x16xf32>
    %180 = vector.extract_strided_slice %167 {offsets = [2, 0], sizes = [1, 16], strides = [1, 1]} : vector<3x16xf32> to vector<1x16xf32>
    %181 = vector.broadcast %180 : vector<1x16xf32> to vector<32x16xf32>
    %182 = arith.mulf %32, %181 : vector<32x16xf32>
    %183 = arith.addf %179, %182 : vector<32x16xf32>
    %184 = arith.truncf %172 : vector<16x16xf32> to vector<16x16xbf16>
    %cst_81 = arith.constant dense<0.000000e+00> : vector<32x16xf32>
    %185 = tpu.matmul %9, %184, %cst_81 {dimension_numbers = #tpu.dot_dimension_numbers<[1], [0], [0], [1], [0, 0, 1, 1], [], []>} : vector<32x16xbf16>, vector<16x16xbf16>, vector<32x16xf32> -> vector<32x16xf32>
    %186 = arith.addf %185, %183 : vector<32x16xf32>
    %cst_82 = arith.constant 0.000000e+00 : f32
    %187 = vector.broadcast %cst_82 : f32 to vector<32x16xf32>
    %188 = arith.cmpf ogt, %186, %187 : vector<32x16xf32>
    %cst_83 = arith.constant 0.00999999977 : f32
    %189 = vector.broadcast %cst_83 : f32 to vector<32x16xf32>
    %190 = arith.mulf %189, %186 : vector<32x16xf32>
    %191 = arith.select %188, %186, %190 : vector<32x16xi1>, vector<32x16xf32>
    %192 = arith.truncf %191 : vector<32x16xf32> to vector<32x16xbf16>
    %cst_84 = arith.constant dense<0.000000e+00> : vector<16x16xf32>
    %193 = tpu.matmul %17, %192, %cst_84 {dimension_numbers = #tpu.dot_dimension_numbers<[1], [0], [0], [1], [0, 0, 1, 1], [], []>} : vector<16x32xbf16>, vector<32x16xbf16>, vector<16x16xf32> -> vector<16x16xf32>
    %194 = vector.broadcast %23 : vector<16x1xf32> to vector<16x16xf32>
    %195 = arith.mulf %194, %193 : vector<16x16xf32>
    %196 = vector.extract_strided_slice %169 {offsets = [0, 0], sizes = [32, 32], strides = [1, 1]} : vector<48x32xbf16> to vector<32x32xbf16>
    %cst_85 = arith.constant dense<0.000000e+00> : vector<16x32xf32>
    %197 = tpu.matmul %163, %196, %cst_85 {dimension_numbers = #tpu.dot_dimension_numbers<[1], [0], [0], [1], [0, 0, 1, 1], [], []>} : vector<16x32xbf16>, vector<32x32xbf16>, vector<16x32xf32> -> vector<16x32xf32>
    %198 = arith.truncf %195 : vector<16x16xf32> to vector<16x16xbf16>
    %199 = vector.extract_strided_slice %169 {offsets = [32, 0], sizes = [16, 32], strides = [1, 1]} : vector<48x32xbf16> to vector<16x32xbf16>
    %cst_86 = arith.constant dense<0.000000e+00> : vector<16x32xf32>
    %200 = tpu.matmul %198, %199, %cst_86 {dimension_numbers = #tpu.dot_dimension_numbers<[1], [0], [0], [1], [0, 0, 1, 1], [], []>} : vector<16x16xbf16>, vector<16x32xbf16>, vector<16x32xf32> -> vector<16x32xf32>
    %201 = arith.addf %197, %200 : vector<16x32xf32>
    %202 = vector.broadcast %171 : vector<1x32xf32> to vector<16x32xf32>
    %203 = arith.addf %201, %202 : vector<16x32xf32>
    %cst_87 = arith.constant 0.000000e+00 : f32
    %204 = vector.broadcast %cst_87 : f32 to vector<16x32xf32>
    %205 = arith.maximumf %203, %204 : vector<16x32xf32>
    %206 = arith.truncf %205 : vector<16x32xf32> to vector<16x32xbf16>
    %c4 = arith.constant 4 : index
    %c0_88 = arith.constant 0 : index
    %c0_89 = arith.constant 0 : index
    %207 = vector.load %arg3[%c4, %c0_88, %c0_89] : memref<5x32x16xbf16, #tpu.memory_space<vmem>>, vector<1x32x16xbf16>
    %208 = vector.shape_cast %207 : vector<1x32x16xbf16> to vector<32x16xbf16>
    %c4_90 = arith.constant 4 : index
    %c0_91 = arith.constant 0 : index
    %c0_92 = arith.constant 0 : index
    %209 = vector.load %arg4[%c4_90, %c0_91, %c0_92] : memref<5x3x16xf32, #tpu.memory_space<vmem>>, vector<1x3x16xf32>
    %210 = vector.shape_cast %209 : vector<1x3x16xf32> to vector<3x16xf32>
    %c4_93 = arith.constant 4 : index
    %c0_94 = arith.constant 0 : index
    %c0_95 = arith.constant 0 : index
    %211 = vector.load %arg5[%c4_93, %c0_94, %c0_95] : memref<5x48x32xbf16, #tpu.memory_space<vmem>>, vector<1x48x32xbf16>
    %212 = vector.shape_cast %211 : vector<1x48x32xbf16> to vector<48x32xbf16>
    %c4_96 = arith.constant 4 : index
    %c0_97 = arith.constant 0 : index
    %c0_98 = arith.constant 0 : index
    %213 = vector.load %arg6[%c4_96, %c0_97, %c0_98] : memref<5x1x32xf32, #tpu.memory_space<vmem>>, vector<1x1x32xf32>
    %214 = vector.shape_cast %213 : vector<1x1x32xf32> to vector<1x32xf32>
    %cst_99 = arith.constant dense<0.000000e+00> : vector<16x16xf32>
    %215 = tpu.matmul %206, %208, %cst_99 {dimension_numbers = #tpu.dot_dimension_numbers<[1], [0], [0], [1], [0, 0, 1, 1], [], []>} : vector<16x32xbf16>, vector<32x16xbf16>, vector<16x16xf32> -> vector<16x16xf32>
    %216 = vector.extract_strided_slice %210 {offsets = [0, 0], sizes = [1, 16], strides = [1, 1]} : vector<3x16xf32> to vector<1x16xf32>
    %217 = vector.broadcast %216 : vector<1x16xf32> to vector<32x16xf32>
    %218 = arith.mulf %26, %217 : vector<32x16xf32>
    %219 = vector.extract_strided_slice %210 {offsets = [1, 0], sizes = [1, 16], strides = [1, 1]} : vector<3x16xf32> to vector<1x16xf32>
    %220 = vector.broadcast %219 : vector<1x16xf32> to vector<32x16xf32>
    %221 = arith.mulf %29, %220 : vector<32x16xf32>
    %222 = arith.addf %218, %221 : vector<32x16xf32>
    %223 = vector.extract_strided_slice %210 {offsets = [2, 0], sizes = [1, 16], strides = [1, 1]} : vector<3x16xf32> to vector<1x16xf32>
    %224 = vector.broadcast %223 : vector<1x16xf32> to vector<32x16xf32>
    %225 = arith.mulf %32, %224 : vector<32x16xf32>
    %226 = arith.addf %222, %225 : vector<32x16xf32>
    %227 = arith.truncf %215 : vector<16x16xf32> to vector<16x16xbf16>
    %cst_100 = arith.constant dense<0.000000e+00> : vector<32x16xf32>
    %228 = tpu.matmul %9, %227, %cst_100 {dimension_numbers = #tpu.dot_dimension_numbers<[1], [0], [0], [1], [0, 0, 1, 1], [], []>} : vector<32x16xbf16>, vector<16x16xbf16>, vector<32x16xf32> -> vector<32x16xf32>
    %229 = arith.addf %228, %226 : vector<32x16xf32>
    %cst_101 = arith.constant 0.000000e+00 : f32
    %230 = vector.broadcast %cst_101 : f32 to vector<32x16xf32>
    %231 = arith.cmpf ogt, %229, %230 : vector<32x16xf32>
    %cst_102 = arith.constant 0.00999999977 : f32
    %232 = vector.broadcast %cst_102 : f32 to vector<32x16xf32>
    %233 = arith.mulf %232, %229 : vector<32x16xf32>
    %234 = arith.select %231, %229, %233 : vector<32x16xi1>, vector<32x16xf32>
    %235 = arith.truncf %234 : vector<32x16xf32> to vector<32x16xbf16>
    %cst_103 = arith.constant dense<0.000000e+00> : vector<16x16xf32>
    %236 = tpu.matmul %17, %235, %cst_103 {dimension_numbers = #tpu.dot_dimension_numbers<[1], [0], [0], [1], [0, 0, 1, 1], [], []>} : vector<16x32xbf16>, vector<32x16xbf16>, vector<16x16xf32> -> vector<16x16xf32>
    %237 = vector.broadcast %23 : vector<16x1xf32> to vector<16x16xf32>
    %238 = arith.mulf %237, %236 : vector<16x16xf32>
    %239 = vector.extract_strided_slice %212 {offsets = [0, 0], sizes = [32, 32], strides = [1, 1]} : vector<48x32xbf16> to vector<32x32xbf16>
    %cst_104 = arith.constant dense<0.000000e+00> : vector<16x32xf32>
    %240 = tpu.matmul %206, %239, %cst_104 {dimension_numbers = #tpu.dot_dimension_numbers<[1], [0], [0], [1], [0, 0, 1, 1], [], []>} : vector<16x32xbf16>, vector<32x32xbf16>, vector<16x32xf32> -> vector<16x32xf32>
    %241 = arith.truncf %238 : vector<16x16xf32> to vector<16x16xbf16>
    %242 = vector.extract_strided_slice %212 {offsets = [32, 0], sizes = [16, 32], strides = [1, 1]} : vector<48x32xbf16> to vector<16x32xbf16>
    %cst_105 = arith.constant dense<0.000000e+00> : vector<16x32xf32>
    %243 = tpu.matmul %241, %242, %cst_105 {dimension_numbers = #tpu.dot_dimension_numbers<[1], [0], [0], [1], [0, 0, 1, 1], [], []>} : vector<16x16xbf16>, vector<16x32xbf16>, vector<16x32xf32> -> vector<16x32xf32>
    %244 = arith.addf %240, %243 : vector<16x32xf32>
    %245 = vector.broadcast %214 : vector<1x32xf32> to vector<16x32xf32>
    %246 = arith.addf %244, %245 : vector<16x32xf32>
    %cst_106 = arith.constant 0.000000e+00 : f32
    %247 = vector.broadcast %cst_106 : f32 to vector<16x32xf32>
    %248 = arith.maximumf %246, %247 : vector<16x32xf32>
    %249 = arith.truncf %248 : vector<16x32xf32> to vector<16x32xbf16>
    %c0_107 = arith.constant 0 : index
    %c0_108 = arith.constant 0 : index
    %250 = vector.load %arg7[%c0_107, %c0_108] : memref<32x32xbf16, #tpu.memory_space<vmem>>, vector<32x32xbf16>
    %cst_109 = arith.constant dense<0.000000e+00> : vector<16x32xf32>
    %251 = tpu.matmul %249, %250, %cst_109 {dimension_numbers = #tpu.dot_dimension_numbers<[1], [0], [0], [1], [0, 0, 1, 1], [], []>} : vector<16x32xbf16>, vector<32x32xbf16>, vector<16x32xf32> -> vector<16x32xf32>
    %c0_110 = arith.constant 0 : index
    %c0_111 = arith.constant 0 : index
    %252 = vector.load %arg8[%c0_110, %c0_111] : memref<1x32xf32, #tpu.memory_space<vmem>>, vector<1x32xf32>
    %253 = vector.broadcast %252 : vector<1x32xf32> to vector<16x32xf32>
    %254 = arith.addf %251, %253 : vector<16x32xf32>
    %cst_112 = arith.constant 0.000000e+00 : f32
    %255 = vector.broadcast %cst_112 : f32 to vector<16x32xf32>
    %256 = arith.maximumf %254, %255 : vector<16x32xf32>
    %257 = arith.truncf %256 : vector<16x32xf32> to vector<16x32xbf16>
    %c0_113 = arith.constant 0 : index
    %c0_114 = arith.constant 0 : index
    %258 = vector.load %arg9[%c0_113, %c0_114] : memref<32x128xbf16, #tpu.memory_space<vmem>>, vector<32x128xbf16>
    %cst_115 = arith.constant dense<0.000000e+00> : vector<16x128xf32>
    %259 = tpu.matmul %257, %258, %cst_115 {dimension_numbers = #tpu.dot_dimension_numbers<[1], [0], [0], [1], [0, 0, 1, 1], [], []>} : vector<16x32xbf16>, vector<32x128xbf16>, vector<16x128xf32> -> vector<16x128xf32>
    %c0_116 = arith.constant 0 : index
    %c0_117 = arith.constant 0 : index
    %260 = vector.load %arg10[%c0_116, %c0_117] : memref<1x128xf32, #tpu.memory_space<vmem>>, vector<1x128xf32>
    %261 = vector.broadcast %260 : vector<1x128xf32> to vector<16x128xf32>
    %262 = arith.addf %259, %261 : vector<16x128xf32>
    %c0_118 = arith.constant 0 : index
    %c0_119 = arith.constant 0 : index
    %263 = vector.load %arg11[%c0_118, %c0_119] : memref<16x128xf32, #tpu.memory_space<vmem>>, vector<16x128xf32>
    tpu.vector_store %arg11[%c0_118, %c0_119], %262 {strides = array<i32>} : memref<16x128xf32, #tpu.memory_space<vmem>>, vector<16x128xf32>,
    return
  }
}

</mosaic_0001>

<bundles_post_ra>
// kernel: tpu_custom_call.1
= control target key start
LH: loop header
LB: loop body
LE: loop exit
PB: predicated region body
PF: predicated region fallthrough
CT: control target
= control target key end

     0   :  { %v2415_v1 = vmov 0.0   ;;  %vm2416_vm0 = vmmov 0   ;;  %v2417_v6 = vmov 0   ;;  %vm85_vm1 = vcmask 261120   ;;  %s3038_s0 = inlined_call_operand.vmem [shape: f32[16,32], index: 0, kind: input, shape index: {}]   ;;  %s3039_s1 = inlined_call_operand.vmem [shape: f32[32,3], index: 1, kind: input, shape index: {}]   ;;  %s3040_s2 = inlined_call_operand.vmem [shape: s32[1,32], index: 2, kind: input, shape index: {}]   ;;  %s3041_s3 = inlined_call_operand.vmem [shape: bf16[5,32,16], index: 3, kind: input, shape index: {}]   ;;  %s3042_s4 = inlined_call_operand.vmem [shape: f32[5,3,16], index: 4, kind: input, shape index: {}]   ;;  %s3043_s5 = inlined_call_operand.vmem [shape: bf16[5,48,32], index: 5, kind: input, shape index: {}]   ;;  %s3044_s6 = inlined_call_operand.vmem [shape: f32[5,1,32], index: 6, kind: input, shape index: {}]   ;;  %s3045_s7 = inlined_call_operand.vmem [shape: bf16[32,32], index: 7, kind: input, shape index: {}]   ;;  %s3046_s8 = inlined_call_operand.vmem [shape: f32[1,32], index: 8, kind: input, shape index: {}]   ;;  %s3047_s9 = inlined_call_operand.vmem [shape: bf16[32,128], index: 9, kind: input, shape index: {}]   ;;  %s3048_s10 = inlined_call_operand.vmem [shape: f32[1,128], index: 10, kind: input, shape index: {}]   ;;  %s3049_s11 = inlined_call_operand.hbm [shape: f32[16,128], index: 11, kind: output, shape index: {}]  }
   0x1   :  { %v2358_v0 = vld [vmem:[%s3041_s3] sm:$0xff]   ;;  %2137 = vmatprep.subr.bf16.mxu0 %v2415_v1  ;;  %v2359_v2 = vld [vmem:[%s3041_s3 + $0x8] sm:$0xff]   ;;  %2141 = vmatprep.mubr.msk.bf16.mxu0 %vm2416_vm0, %v2415_v1  ;;  %v42_v8 = vld [vmem:[%s3039_s1 + $0x10] sm:$0xff]  ;;  %v2418_v19 = vmov 1  }
   0x2   :  { %2138 = vmatpush3.bf16.msra.mxu0 %v2358_v0  ;;  %v150_v3 = vld [vmem:[%s3038_s0] sm:$0xff]  ;;  %v151_v4 = vld [vmem:[%s3038_s0 + $0x8] sm:$0xff]  ;;  %2349 = vset.pattern.permute.xlu0 %v2417_v6  ;;  %v43_v10 = vld [vmem:[%s3039_s1 + $0x18] sm:$0xff]  ;;  %v2337_v11 = vtrunc.f32 %v42_v8 }
   0x3   :  { %v40_v5 = vld [vmem:[%s3039_s1] sm:$0xff]  ;;  %2139 = vmatprep.subr.bf16.mxu0 %v2415_v1  ;;  %v41_v9 = vld [vmem:[%s3039_s1 + $0x8] sm:$0xff]  ;;  %2350 = vset.pattern.permute.xlu1 %v2417_v6  ;;  %v2339_v13 = vtrunc.f32 %v43_v10  ;;  %v2511_v14 = vpack.c.bf16 %v151_v4, %v150_v3 }
   0x4   :  { %v2333_v7 = vtrunc.f32 %v40_v5  ;;  %v2335_v12 = vtrunc.f32 %v41_v9  ;;  %v2338_v16 = vcvt.f32.s32 %v2337_v11 }
   0x5   :  { %v2340_v18 = vcvt.f32.s32 %v2339_v13 }
   0x6   :  { %v2334_v15 = vcvt.f32.s32 %v2333_v7  ;;  %2140 = vmatpush3.bf16.msra.mxu0 %v2359_v2  ;;  %v2336_v17 = vcvt.f32.s32 %v2335_v12  ;;  %57 = vperm.xlu1 %2350, %v2338_v16  }
   0x7   :  { %2159 = vmatprep.subr.bf16.mxu0 %v2415_v1 }
   0x8   :  { %51 = vperm.xlu0 %2349, %v2334_v15  }
   0x9   :  { %2142 = vmatmul.mubr.msk.bf16.vlgmr.msra.gmra.mrb[0].mxu0 %vm85_vm1, %v2511_v14 }
   0xa   :  { %2161 = vmatprep.mubr.msk.bf16.mxu0 %vm2416_vm0, %v2415_v1  ;;  %60 = vperm.xlu1 %2350, %v2340_v18  }
   0xc   :  { %54 = vperm.xlu0 %2349, %v2336_v17  }
   0xe   :  { %105 = vperm.xlu1 %2350, %v41_v9  }
  0x10   :  { %100 = vperm.xlu0 %2349, %v40_v5  }
  0x12   :  { %2352 = vset.pattern.permute.xlu1 %v2418_v19 }
  0x13   :  { %123 = vperm.xlu1 %2352, %v41_v9  }
  0x14   :  { %2351 = vset.pattern.permute.xlu0 %v2418_v19 }
  0x15   :  { %119 = vperm.xlu0 %2351, %v40_v5  }
  0x16   :  { %16 = vsyncpa [#allocation3], 0  ;;  %v2419_v20 = vmov 2   ;;  %v48_v21 = vlaneseq  ;;  %v1961_v27 = vld [vmem:[%s3042_s4 + $0x4] sm:$0x7]  ;;  %vm254_vm4 = vcmask 130048  }
  0x17   :  { %2353 = vset.pattern.permute.xlu1 %v2419_v20  ;;  %v1985_v28 = vld [vmem:[%s3042_s4 + $0x8] sm:$0x7]  ;;  %v2009_v29 = vld [vmem:[%s3042_s4 + $0xc] sm:$0x7]  ;;  %v2033_v33 = vld [vmem:[%s3042_s4 + $0x10] sm:$0x7] }
  0x18   :  { %135 = vperm.xlu1 %2353, %v40_v5   ;;  %v2518_v22 = vand.u32 127, %v48_v21  ;;  %v2520_v23 = vshrl.u32 %v48_v21, 7 }
  0x19   :  { %127 = vperm.xlu0 %2351, %v42_v8  }
  0x1a   :  { %v2523_v25 = vsub.s32 0, %v2520_v23  ;;  %v2538_v30 = vsub.s32 1, %v2520_v23  ;;  %v2565_v42 = vsub.s32 2, %v2520_v23 }
  0x1c   :  { %2354 = vset.pattern.permute.xlu1 %v2417_v6  ;;  %v2548_v35 = vrot.slane %v1961_v27, %v2523_v25  ;;  %v2551_v36 = vrot.slane %v1985_v28, %v2523_v25  ;;  %v2554_v37 = vrot.slane %v2009_v29, %v2523_v25  ;;  %v2560_v40 = vrot.slane %v2033_v33, %v2523_v25 }
  0x1d   :  { %2355 = vset.pattern.permute.xlu0 %v2419_v20  ;;  %110 = vperm.xlu1 %2354, %v42_v8   ;;  %v2568_v43 = vrot.slane %v1961_v27, %v2538_v30  ;;  %v2577_v46 = vrot.slane %v1985_v28, %v2538_v30  ;;  %v2588_v51 = vrot.slane %v2009_v29, %v2538_v30 }
  0x1e   :  { %139 = vperm.xlu0 %2355, %v41_v9   ;;  %v2599_v56 = vrot.slane %v1961_v27, %v2565_v42  ;;  %v2610_v61 = vrot.slane %v2033_v33, %v2538_v30  ;;  %v2615_v63 = vrot.slane %v1985_v28, %v2565_v42  ;;  %v2622_v5 = vrot.slane %v2009_v29, %v2565_v42 }
  0x1f   :  { %v2627_v11 = vrot.slane %v2033_v33, %v2565_v42 }
  0x21   :  { %115 = vperm.xlu1 %2354, %v43_v10  }
  0x22   :  { %147 = vperm.xlu0 %2355, %v43_v10  }
  0x25   :  { %2356 = vset.pattern.permute.xlu1 %v2418_v19 }
  0x26   :  { %131 = vperm.xlu1 %2356, %v43_v10  }
  0x2a   :  { %2357 = vset.pattern.permute.xlu1 %v2419_v20 }
  0x2b   :  { %143 = vperm.xlu1 %2357, %v42_v8  }
  0x85   :  { %v2526_v26 = vpop.permute.xlu1 %57 }
  0x86   :  { %vm64_vm5 = vcmp.eq.s32.totalorder %v2518_v22, %v2526_v26 }
  0x87   :  { %v52_v24 = vpop.permute.xlu0 %51 }
  0x88   :  { %vm62_vm2 = vcmp.eq.s32.totalorder %v2518_v22, %v52_v24 }
  0x89   :  { %v66_v31 = vsel %vm62_vm2, 1.0, %v2415_v1  ;;  %v2545_v34 = vpop.permute.xlu1 %60 }
  0x8a   :  { %vm65_vm6 = vcmp.eq.s32.totalorder %v2518_v22, %v2545_v34 }
  0x8b   :  { %v55_v32 = vpop.permute.xlu0 %54 }
  0x8c   :  { %vm63_vm3 = vcmp.eq.s32.totalorder %v2518_v22, %v55_v32 }
  0x8d   :  { %v67_v38 = vsel %vm63_vm3, 1.0, %v2415_v1  ;;  %v2570_v44 = vpop.permute.xlu1 %105 }
  0x8e   :  { %v2557_v39 = vpack.c.bf16 %v67_v38, %v66_v31  ;;  %v562_v49 = vmul.f32 %v2548_v35, %v2570_v44  ;;  %v888_v50 = vmul.f32 %v2551_v36, %v2570_v44  ;;  %v1214_v52 = vmul.f32 %v2554_v37, %v2570_v44 }
  0x8f   :  { %v2562_v41 = vpop.permute.xlu0 %100  ;;  %v1540_v54 = vmul.f32 %v2560_v40, %v2570_v44 }
  0x90   :  { %2147 = vmatprep.mubr.msk.bf16.mxu1 %vm254_vm4, %v2557_v39  ;;  %v561_v45 = vmul.f32 %v2548_v35, %v2562_v41  ;;  %v887_v47 = vmul.f32 %v2551_v36, %v2562_v41  ;;  %v1213_v48 = vmul.f32 %v2554_v37, %v2562_v41  ;;  %v1539_v53 = vmul.f32 %v2560_v40, %v2562_v41 }
  0x92   :  { %v2601_v57 = vpop.permute.xlu1 %123 }
  0x93   :  { %v570_v62 = vmul.f32 %v2568_v43, %v2601_v57  ;;  %v896_v0 = vmul.f32 %v2577_v46, %v2601_v57  ;;  %v1222_v2 = vmul.f32 %v2588_v51, %v2601_v57  ;;  %v1548_v13 = vmul.f32 %v2610_v61, %v2601_v57 }
  0x94   :  { %v2596_v55 = vpop.permute.xlu0 %119 }
  0x95   :  { %v569_v58 = vmul.f32 %v2568_v43, %v2596_v55  ;;  %v895_v59 = vmul.f32 %v2577_v46, %v2596_v55  ;;  %v1221_v60 = vmul.f32 %v2588_v51, %v2596_v55  ;;  %v574_v8 = vadd.f32 %v570_v62, %v562_v49 }
  0x96   :  { %v900_v9 = vadd.f32 %v896_v0, %v888_v50  ;;  %v1226_v10 = vadd.f32 %v1222_v2, %v1214_v52  ;;  %v1547_v12 = vmul.f32 %v2610_v61, %v2596_v55  ;;  %v1552_v21 = vadd.f32 %v1548_v13, %v1540_v54 }
  0x97   :  { %v573_v3 = vadd.f32 %v569_v58, %v561_v45  ;;  %v899_v4 = vadd.f32 %v895_v59, %v887_v47  ;;  %v1225_v6 = vadd.f32 %v1221_v60, %v1213_v48  ;;  %v2633_v15 = vpop.permute.xlu1 %135  ;;  %v68_v60 = vsel %vm64_vm5, 1.0, %v2415_v1 }
  0x98   :  { %v2624_v7 = vpop.permute.xlu0 %127  ;;  %v581_v16 = vmul.f32 %v2599_v56, %v2633_v15  ;;  %v907_v17 = vmul.f32 %v2615_v63, %v2633_v15  ;;  %v1233_v18 = vmul.f32 %v2622_v5, %v2633_v15  ;;  %v1551_v19 = vadd.f32 %v1547_v12, %v1539_v53 }
  0x99   :  { %v1559_v20 = vmul.f32 %v2627_v11, %v2633_v15  ;;  %v69_v62 = vsel %vm65_vm6, 1.0, %v2415_v1  ;;  %v897_v12 = vmul.f32 %v2577_v46, %v2624_v7 }
  0x9a   :  { %v2645_v27 = vadd.f32 %v581_v16, %v573_v3  ;;  %v2647_v28 = vadd.f32 %v907_v17, %v899_v4  ;;  %v2649_v29 = vadd.f32 %v1233_v18, %v1225_v6  ;;  %v2675_v0 = vpack.c.bf16 %v69_v62, %v68_v60 }
  0x9b   :  { %v2657_v38 = vadd.f32 %v1559_v20, %v1551_v19  ;;  %v571_v6 = vmul.f32 %v2568_v43, %v2624_v7 }
  0x9c   :  { %v111_v22 = vpop.permute.xlu1 %110 }
  0x9d   :  { %v2643_v24 = vpop.permute.xlu0 %139  ;;  %v563_v4 = vmul.f32 %v2548_v35, %v111_v22 }
  0x9e   :  { %v582_v31 = vmul.f32 %v2599_v56, %v2643_v24  ;;  %v908_v32 = vmul.f32 %v2615_v63, %v2643_v24  ;;  %v1234_v33 = vmul.f32 %v2622_v5, %v2643_v24  ;;  %v1560_v45 = vmul.f32 %v2627_v11, %v2643_v24 }
  0x9f   :  { %v575_v13 = vadd.f32 %v571_v6, %v563_v4 }
  0xa0   :  { %v2661_v47 = vadd.f32 %v582_v31, %v574_v8  ;;  %v2663_v48 = vadd.f32 %v908_v32, %v900_v9  ;;  %v2665_v49 = vadd.f32 %v1234_v33, %v1226_v10  ;;  %v2667_v50 = vadd.f32 %v1560_v45, %v1552_v21  ;;  %v2682_v26 = vpop.permute.xlu1 %115 }
  0xa1   :  { %v2688_v3 = vpop.permute.xlu0 %147  ;;  %v564_v8 = vmul.f32 %v2548_v35, %v2682_v26  ;;  %v889_v10 = vmul.f32 %v2551_v36, %v111_v22 }
  0xa2   :  { %v584_v18 = vmul.f32 %v2599_v56, %v2688_v3  ;;  %v910_v33 = vmul.f32 %v2615_v63, %v2688_v3 }
  0xa3   :  { %v901_v19 = vadd.f32 %v897_v12, %v889_v10 }
  0xa5   :  { %v2684_v34 = vpop.permute.xlu1 %131 }
  0xa6   :  { %v572_v9 = vmul.f32 %v2568_v43, %v2684_v34  ;;  %v890_v43 = vmul.f32 %v2551_v36, %v2682_v26  ;;  %v898_v21 = vmul.f32 %v2577_v46, %v2684_v34  ;;  %v1216_v36 = vmul.f32 %v2554_v37, %v2682_v26 }
  0xa7   :  { %v1224_v46 = vmul.f32 %v2588_v51, %v2684_v34 }
  0xa8   :  { %v576_v17 = vadd.f32 %v572_v9, %v564_v8  ;;  %v902_v45 = vadd.f32 %v898_v21, %v890_v43 }
  0xa9   :  { %v1228_v4 = vadd.f32 %v1224_v46, %v1216_v36 }
  0xaa   :  { %v2686_v2 = vpop.permute.xlu1 %143  ;;  %v2712_v31 = vadd.f32 %v584_v18, %v576_v17 }
  0xab   :  { %v583_v16 = vmul.f32 %v2599_v56, %v2686_v2  ;;  %v909_v35 = vmul.f32 %v2615_v63, %v2686_v2  ;;  %v1215_v56 = vmul.f32 %v2554_v37, %v111_v22  ;;  %v1541_v63 = vmul.f32 %v2560_v40, %v111_v22 }
  0xac   :  { %v1561_v62 = vmul.f32 %v2627_v11, %v2686_v2  ;;  %v1542_v37 = vmul.f32 %v2560_v40, %v2682_v26  ;;  %v1944_v40 = vld [vmem:[%s3040_s2] ss:$0 sm:$0xff] }
  0xad   :  { %v2706_v20 = vadd.f32 %v583_v16, %v575_v13  ;;  %v2714_v32 = vadd.f32 %v909_v35, %v901_v19  ;;  %v74_v16 = vadd.s32 8, %v2520_v23  ;;  %vm80_vm7 = vcmp.eq.s32.totalorder %v2520_v23, %v1944_v40  ;;  %v157_v35 = vld [vmem:[%s3042_s4] sm:$0x7] }
  0xae   :  { %v224_v43 = vrot.slane %v157_v35, %v2523_v25  ;;  %v232_v23 = vrot.slane %v157_v35, %v2538_v30 }
  0xaf   :  { %vm81_vm8 = vcmp.eq.s32.totalorder %v74_v16, %v1944_v40 }
  0xb0   :  { %v227_v21 = vmul.f32 %v224_v43, %v111_v22  ;;  %v236_v36 = vmul.f32 %v232_v23, %v2684_v34  ;;  %v226_v46 = vmul.f32 %v224_v43, %v2570_v44 }
  0xdc   :  { %v214_v52 = vpop.f32.mrb[0].mxu0 }
  0xdd   :  { %v2143_v53 = vpop.f32.mrb[1].mxu0 }
  0xde   :  { %v217_v54 = vpop.f32.mrb[2].mxu0  ;;  %v1235_v53 = vmul.f32 %v2622_v5, %v2686_v2 }
  0xdf   :  { %v253_v58 = vpack.c.bf16 %v217_v54, %v214_v52  ;;  %v2144_v59 = vpop.f32.mrb[3].mxu0  ;;  %v1223_v52 = vmul.f32 %v2588_v51, %v2624_v7  ;;  %v1236_v54 = vmul.f32 %v2622_v5, %v2688_v3  ;;  %v1550_v51 = vmul.f32 %v2610_v61, %v2684_v34 }
  0xe0   :  { %v2732_v59 = vadd.f32 %v910_v33, %v902_v45  ;;  %v1562_v5 = vmul.f32 %v2627_v11, %v2688_v3  ;;  %v83_v11 = vsel %vm81_vm8, 1.0, %v2415_v1  ;;  %v235_v33 = vmul.f32 %v232_v23, %v2624_v7 }
  0xe1   :  { %2145 = vmatprep.subr.bf16.mxu1 %v253_v58  ;;  %v1227_v60 = vadd.f32 %v1223_v52, %v1215_v56  ;;  %v2744_v9 = vadd.f32 %v1236_v54, %v1228_v4  ;;  %v1554_v12 = vadd.f32 %v1550_v51, %v1542_v37  ;;  %v89_v19 = vsel %vm85_vm1, %v83_v11, 0.0 }
  0xe2   :  { %2146 = vmatpush3.bf16.msra.mxu1 %v253_v58  ;;  %v1549_v58 = vmul.f32 %v2610_v61, %v2624_v7  ;;  %v82_v61 = vsel %vm80_vm7, 1.0, %v2415_v1  ;;  %90 = vadd.xlane.f32.xlu0 %v89_v19  ;;  %v244_v56 = vrot.slane %v157_v35, %v2565_v42  ;;  %v225_v45 = vmul.f32 %v224_v43, %v2562_v41  ;;  %v2360_v19 = vld [vmem:[%s3043_s5] sm:$0xff]   ;;  %v2361_v35 = vld [vmem:[%s3043_s5 + $0x8] sm:$0xff]  }
  0xe3   :  { %2151 = vmatprep.subr.bf16.mxu1 %v2415_v1  ;;  %v2742_v8 = vadd.f32 %v1235_v53, %v1227_v60  ;;  %v2748_v13 = vadd.f32 %v1562_v5, %v1554_v12  ;;  %v2757_v17 = vpack.c.bf16 %v83_v11, %v82_v61  ;;  %v86_v18 = vsel %vm85_vm1, %v82_v61, 0.0 }
  0xe4   :  { %v1553_v6 = vadd.f32 %v1549_v58, %v1541_v63  ;;  %87 = vadd.xlane.f32.xlu1 %v86_v18  ;;  %v233_v52 = vmul.f32 %v232_v23, %v2596_v55  ;;  %v228_v53 = vmul.f32 %v224_v43, %v2682_v26  ;;  %v234_v54 = vmul.f32 %v232_v23, %v2601_v57  ;;  %v2362_v43 = vld [vmem:[%s3043_s5 + $0x10] sm:$0xff]  }
  0xe5   :  { %2148 = vmatmul.mubr.msk.bf16.vlgmr.msra.gmra.mrb[0].mxu1 %vm254_vm4, %v2675_v0  ;;  %v239_v25 = vadd.f32 %v235_v33, %v227_v21  ;;  %v247_v30 = vmul.f32 %v244_v56, %v2686_v2  ;;  %v245_v7 = vmul.f32 %v244_v56, %v2633_v15  ;;  %v248_v42 = vmul.f32 %v244_v56, %v2688_v3 }
  0xe6   :  { %2155 = vmatprep.mubr.msk.bf16.mxu1 %vm2416_vm0, %v2415_v1  ;;  %v2746_v10 = vadd.f32 %v1561_v62, %v1553_v6  ;;  %v237_v22 = vadd.f32 %v233_v52, %v225_v45  ;;  %v240_v63 = vadd.f32 %v236_v36, %v228_v53  ;;  %v238_v41 = vadd.f32 %v234_v54, %v226_v46 }
  0xe7   :  { %v246_v55 = vmul.f32 %v244_v56, %v2643_v24  ;;  %v251_v58 = vadd.f32 %v247_v30, %v239_v25  ;;  %2160 = vmatpush3.bf16.msra.mxu0 %v2362_v43 }
  0xe8   :  { %v249_v60 = vadd.f32 %v245_v7, %v237_v22  ;;  %v252_v44 = vadd.f32 %v248_v42, %v240_v63  ;;  %2173 = vmatprep.subr.bf16.mxu0 %v2415_v1 }
  0xe9   :  { %v250_v4 = vadd.f32 %v246_v55, %v238_v41  ;;  %v2363_v41 = vld [vmem:[%s3041_s3 + $0x10] sm:$0xff]   ;;  %v2364_v55 = vld [vmem:[%s3041_s3 + $0x18] sm:$0xff]  }
 0x16f   :  { %v91_v21 = vpop.xlane.xlu0 %90 }
 0x170   :  { %v93_v56 = vmax.f32 %v91_v21, 1.0 }
 0x171   :  { %v88_v23 = vpop.xlane.xlu1 %87 }
 0x172   :  { %v92_v33 = vmax.f32 %v88_v23, 1.0 }
 0x174   :  { %2387 = vrcp.f32 %v92_v33 }
 0x175   :  { %2389 = vrcp.f32 %v93_v56 }
 0x17e   :  { %v2799_v45 = vpop.eup %2387 }
 0x17f   :  { %v2801_v52 = vpop.eup %2389 }
 0x1b8   :  { %v2149_v26 = vpop.f32.mrb[0].mxu1 }
 0x1b9   :  { %v304_v34 = vadd.f32 %v2149_v26, %v251_v58  ;;  %v295_v62 = vpop.f32.mrb[1].mxu1  ;;  %v1956_v58 = vld [vmem:[%s3044_s6] ss:$0 sm:$0xff] }
 0x1ba   :  { %v296_v37 = vadd.f32 %v295_v62, %v249_v60  ;;  %v2150_v57 = vpop.f32.mrb[2].mxu1 }
 0x1bb   :  { %v316_v6 = vmul.f32 0.01, %v304_v34  ;;  %v307_v2 = vadd.f32 %v2150_v57, %v252_v44  ;;  %v298_v51 = vpop.f32.mrb[3].mxu1  ;;  %vm312_vm9 = vcmp.gt.f32.partialorder %v304_v34, 0.0 }
 0x1bc   :  { %v314_v15 = vmul.f32 0.01, %v296_v37  ;;  %v299_v5 = vadd.f32 %v298_v51, %v250_v4  ;;  %vm310_vm10 = vcmp.gt.f32.partialorder %v296_v37, 0.0 }
 0x1bd   :  { %vm313_vm11 = vcmp.gt.f32.partialorder %v307_v2, 0.0  ;;  %v317_v3 = vmul.f32 0.01, %v307_v2  ;;  %v320_v12 = vsel %vm312_vm9, %v304_v34, %v316_v6 }
 0x1be   :  { %vm311_vm12 = vcmp.gt.f32.partialorder %v299_v5, 0.0  ;;  %v315_v24 = vmul.f32 0.01, %v299_v5  ;;  %v318_v40 = vsel %vm310_vm10, %v296_v37, %v314_v15 }
 0x1bf   :  { %v321_v16 = vsel %vm313_vm11, %v307_v2, %v317_v3 }
 0x1c0   :  { %v323_v61 = vpack.c.bf16 %v321_v16, %v320_v12  ;;  %v319_v11 = vsel %vm311_vm12, %v299_v5, %v315_v24 }
 0x1c1   :  { %v322_v18 = vpack.c.bf16 %v319_v11, %v318_v40 }
 0x1c3   :  { %2152 = vmatpush3.bf16.msra.mxu1 %v322_v18 }
 0x1c4   :  { %2153 = vmatprep.subr.bf16.mxu1 %v2415_v1 }
 0x1c7   :  { %2154 = vmatpush3.bf16.msra.mxu1 %v323_v61 }
 0x1c8   :  { %2165 = vmatprep.subr.bf16.mxu1 %v2415_v1 }
 0x1ca   :  { %2156 = vmatmul.mubr.msk.bf16.vlgmr.msra.gmra.mrb[4].mxu1 %vm85_vm1, %v2757_v17 }
 0x1cb   :  { %2166 = vmatpush3.bf16.msra.mxu1 %v2360_v19  ;;  %2169 = vmatprep.mubr.msk.bf16.mxu1 %vm2416_vm0, %v2415_v1 }
 0x1cc   :  { %2167 = vmatprep.subr.bf16.mxu1 %v2415_v1 }
 0x1cf   :  { %2168 = vmatpush3.bf16.msra.mxu1 %v2361_v35 }
 0x1d2   :  { %2170 = vmatmul.mubr.msk.bf16.vlgmr.msra.gmra.mrb[8].mxu1 %vm85_vm1, %v2511_v14 }
 0x1d3   :  { %2183 = vmatprep.mubr.msk.bf16.mxu1 %vm254_vm4, %v2557_v39 }
 0x29d   :  { %v361_v14 = vpop.f32.mrb[4].mxu1 }
 0x29e   :  { %v2157_v53 = vpop.f32.mrb[5].mxu1  ;;  %v368_v46 = vmul.f32 %v2799_v45, %v361_v14 }
 0x29f   :  { %v364_v36 = vpop.f32.mrb[6].mxu1 }
 0x2a0   :  { %v369_v54 = vmul.f32 %v2801_v52, %v364_v36  ;;  %v2158_v25 = vpop.f32.mrb[7].mxu1 }
 0x2a2   :  { %v370_v30 = vpack.c.bf16 %v369_v54, %v368_v46  ;;  %v2367_v54 = vld [vmem:[%s3043_s5 + $0x28] sm:$0xff]  }
 0x2a4   :  { %2162 = vmatmul.mubr.msk.bf16.vlgmr.msra.gmra.mrb[4].mxu0 %vm254_vm4, %v370_v30 }
 0x2a5   :  { %v467_v22 = vpop.f32.mrb[8].mxu1  ;;  %2177 = vmatprep.mubr.msk.bf16.mxu0 %vm2416_vm0, %v2415_v1  ;;  %2174 = vmatpush3.bf16.msra.mxu0 %v2363_v41 }
 0x2a6   :  { %v2171_v7 = vpop.f32.mrb[9].mxu1  ;;  %2175 = vmatprep.subr.bf16.mxu0 %v2415_v1 }
 0x2a7   :  { %v470_v63 = vpop.f32.mrb[10].mxu1 }
 0x2a8   :  { %v2172_v42 = vpop.f32.mrb[11].mxu1 }
 0x2a9   :  { %2176 = vmatpush3.bf16.msra.mxu0 %v2364_v55 }
 0x2aa   :  { %2187 = vmatprep.subr.bf16.mxu0 %v2415_v1 }
 0x377   :  { %v414_v26 = vpop.f32.mrb[4].mxu0 }
 0x378   :  { %v468_v60 = vadd.f32 %v467_v22, %v414_v26  ;;  %v2163_v34 = vpop.f32.mrb[5].mxu0 }
 0x379   :  { %v417_v62 = vpop.f32.mrb[6].mxu0  ;;  %v2368_v34 = vld [vmem:[%s3041_s3 + $0x20] sm:$0xff]  }
 0x37a   :  { %v480_v44 = vadd.f32 %v1956_v58, %v468_v60  ;;  %v471_v37 = vadd.f32 %v470_v63, %v417_v62  ;;  %v2164_v57 = vpop.f32.mrb[7].mxu0  ;;  %v2369_v62 = vld [vmem:[%s3041_s3 + $0x28] sm:$0xff]  }
 0x37c   :  { %v481_v4 = vadd.f32 %v1956_v58, %v471_v37  ;;  %v482_v6 = vmax.f32 %v480_v44, 0.0  ;;  %v1980_v44 = vld [vmem:[%s3044_s6 + $0x1] ss:$0 sm:$0xff] }
 0x37e   :  { %v483_v2 = vmax.f32 %v481_v4, 0.0 }
 0x380   :  { %v484_v51 = vpack.c.bf16 %v483_v2, %v482_v6 }
 0x382   :  { %2178 = vmatmul.mubr.msk.bf16.vlgmr.msra.gmra.mrb[8].mxu0 %vm85_vm1, %v484_v51 }
 0x383   :  { %2191 = vmatprep.mubr.msk.bf16.mxu0 %vm2416_vm0, %v2415_v1 }
 0x455   :  { %v550_v15 = vpop.f32.mrb[8].mxu0 }
 0x456   :  { %v2179_v5 = vpop.f32.mrb[9].mxu0 }
 0x457   :  { %v553_v3 = vpop.f32.mrb[10].mxu0 }
 0x458   :  { %v589_v24 = vpack.c.bf16 %v553_v3, %v550_v15  ;;  %v2180_v12 = vpop.f32.mrb[11].mxu0 }
 0x45a   :  { %2181 = vmatprep.subr.bf16.mxu1 %v589_v24 }
 0x45b   :  { %2182 = vmatpush3.bf16.msra.mxu1 %v589_v24 }
 0x45c   :  { %2195 = vmatprep.subr.bf16.mxu1 %v2415_v1 }
 0x45e   :  { %2184 = vmatmul.mubr.msk.bf16.vlgmr.msra.gmra.mrb[12].mxu1 %vm254_vm4, %v2675_v0 }
 0x45f   :  { %2197 = vmatprep.mubr.msk.bf16.mxu1 %vm2416_vm0, %v2415_v1  ;;  %2196 = vmatpush3.bf16.msra.mxu1 %v2367_v54 }
 0x460   :  { %2209 = vmatprep.subr.bf16.mxu1 %v2415_v1 }
 0x531   :  { %v2185_v16 = vpop.f32.mrb[12].mxu1 }
 0x532   :  { %v633_v40 = vadd.f32 %v2185_v16, %v2706_v20  ;;  %v624_v61 = vpop.f32.mrb[13].mxu1 }
 0x533   :  { %v625_v11 = vadd.f32 %v624_v61, %v2645_v27  ;;  %v2186_v18 = vpop.f32.mrb[14].mxu1 }
 0x534   :  { %v645_v19 = vmul.f32 0.01, %v633_v40  ;;  %v636_v35 = vadd.f32 %v2186_v18, %v2712_v31  ;;  %v627_v43 = vpop.f32.mrb[15].mxu1  ;;  %vm641_vm13 = vcmp.gt.f32.partialorder %v633_v40, 0.0  ;;  %v2365_v31 = vld [vmem:[%s3043_s5 + $0x18] sm:$0xff]  }
 0x535   :  { %v643_v23 = vmul.f32 0.01, %v625_v11  ;;  %v628_v21 = vadd.f32 %v627_v43, %v2661_v47  ;;  %vm639_vm14 = vcmp.gt.f32.partialorder %v625_v11, 0.0  ;;  %v2366_v47 = vld [vmem:[%s3043_s5 + $0x20] sm:$0xff]  }
 0x536   :  { %vm642_vm15 = vcmp.gt.f32.partialorder %v636_v35, 0.0  ;;  %v646_v33 = vmul.f32 0.01, %v636_v35  ;;  %v649_v14 = vsel %vm641_vm13, %v633_v40, %v645_v19 }
 0x537   :  { %vm640_vm2 = vcmp.gt.f32.partialorder %v628_v21, 0.0  ;;  %v644_v56 = vmul.f32 0.01, %v628_v21  ;;  %v647_v20 = vsel %vm639_vm14, %v625_v11, %v643_v23 }
 0x538   :  { %v650_v53 = vsel %vm642_vm15, %v636_v35, %v646_v33 }
 0x539   :  { %v652_v36 = vpack.c.bf16 %v650_v53, %v649_v14  ;;  %v648_v46 = vsel %vm640_vm2, %v628_v21, %v644_v56 }
 0x53a   :  { %v651_v27 = vpack.c.bf16 %v648_v46, %v647_v20 }
 0x53c   :  { %2188 = vmatpush3.bf16.msra.mxu0 %v651_v27 }
 0x53d   :  { %2189 = vmatprep.subr.bf16.mxu0 %v2415_v1 }
 0x540   :  { %2190 = vmatpush3.bf16.msra.mxu0 %v652_v36 }
 0x541   :  { %2201 = vmatprep.subr.bf16.mxu0 %v2415_v1 }
 0x543   :  { %2192 = vmatmul.mubr.msk.bf16.vlgmr.msra.gmra.mrb[12].mxu0 %vm85_vm1, %v2757_v17 }
 0x544   :  { %2202 = vmatpush3.bf16.msra.mxu0 %v2365_v31  ;;  %2205 = vmatprep.mubr.msk.bf16.mxu0 %vm2416_vm0, %v2415_v1 }
 0x545   :  { %2203 = vmatprep.subr.bf16.mxu0 %v2415_v1 }
 0x548   :  { %2204 = vmatpush3.bf16.msra.mxu0 %v2366_v47 }
 0x54b   :  { %2206 = vmatmul.mubr.msk.bf16.vlgmr.msra.gmra.mrb[16].mxu0 %vm85_vm1, %v484_v51 }
 0x54c   :  { %2219 = vmatprep.mubr.msk.bf16.mxu0 %vm254_vm4, %v2557_v39 }
 0x616   :  { %v687_v25 = vpop.f32.mrb[12].mxu0 }
 0x617   :  { %v2193_v30 = vpop.f32.mrb[13].mxu0  ;;  %v694_v7 = vmul.f32 %v2799_v45, %v687_v25  ;;  %v2372_v25 = vld [vmem:[%s3043_s5 + $0x40] sm:$0xff]  }
 0x618   :  { %v690_v22 = vpop.f32.mrb[14].mxu0 }
 0x619   :  { %v695_v63 = vmul.f32 %v2801_v52, %v690_v22  ;;  %v2194_v42 = vpop.f32.mrb[15].mxu0 }
 0x61b   :  { %v696_v41 = vpack.c.bf16 %v695_v63, %v694_v7 }
 0x61d   :  { %2198 = vmatmul.mubr.msk.bf16.vlgmr.msra.gmra.mrb[16].mxu1 %vm254_vm4, %v696_v41 }
 0x61e   :  { %v793_v55 = vpop.f32.mrb[16].mxu0  ;;  %2213 = vmatprep.mubr.msk.bf16.mxu1 %vm2416_vm0, %v2415_v1  ;;  %2210 = vmatpush3.bf16.msra.mxu1 %v2368_v34 }
 0x61f   :  { %v2207_v58 = vpop.f32.mrb[17].mxu0  ;;  %2211 = vmatprep.subr.bf16.mxu1 %v2415_v1 }
 0x620   :  { %v796_v26 = vpop.f32.mrb[18].mxu0 }
 0x621   :  { %v2208_v60 = vpop.f32.mrb[19].mxu0 }
 0x622   :  { %2212 = vmatpush3.bf16.msra.mxu1 %v2369_v62  ;;  %v2373_v62 = vld [vmem:[%s3041_s3 + $0x30] sm:$0xff]  }
 0x623   :  { %2223 = vmatprep.subr.bf16.mxu1 %v2415_v1 }
 0x6f0   :  { %v740_v37 = vpop.f32.mrb[16].mxu1 }
 0x6f1   :  { %v794_v57 = vadd.f32 %v793_v55, %v740_v37  ;;  %v2199_v4 = vpop.f32.mrb[17].mxu1  ;;  %v2004_v37 = vld [vmem:[%s3044_s6 + $0x2] ss:$0 sm:$0xff] }
 0x6f2   :  { %v743_v6 = vpop.f32.mrb[18].mxu1 }
 0x6f3   :  { %v806_v2 = vadd.f32 %v1980_v44, %v794_v57  ;;  %v797_v51 = vadd.f32 %v796_v26, %v743_v6  ;;  %v2200_v15 = vpop.f32.mrb[19].mxu1 }
 0x6f5   :  { %v807_v5 = vadd.f32 %v1980_v44, %v797_v51  ;;  %v808_v3 = vmax.f32 %v806_v2, 0.0  ;;  %v2374_v44 = vld [vmem:[%s3041_s3 + $0x38] sm:$0xff]  }
 0x6f7   :  { %v809_v24 = vmax.f32 %v807_v5, 0.0 }
 0x6f9   :  { %v810_v12 = vpack.c.bf16 %v809_v24, %v808_v3 }
 0x6fb   :  { %2214 = vmatmul.mubr.msk.bf16.vlgmr.msra.gmra.mrb[20].mxu1 %vm85_vm1, %v810_v12 }
 0x6fc   :  { %2227 = vmatprep.mubr.msk.bf16.mxu1 %vm2416_vm0, %v2415_v1 }
 0x7ce   :  { %v876_v16 = vpop.f32.mrb[20].mxu1 }
 0x7cf   :  { %v2215_v40 = vpop.f32.mrb[21].mxu1 }
 0x7d0   :  { %v879_v61 = vpop.f32.mrb[22].mxu1 }
 0x7d1   :  { %v915_v11 = vpack.c.bf16 %v879_v61, %v876_v16  ;;  %v2216_v18 = vpop.f32.mrb[23].mxu1 }
 0x7d3   :  { %2217 = vmatprep.subr.bf16.mxu0 %v915_v11 }
 0x7d4   :  { %2218 = vmatpush3.bf16.msra.mxu0 %v915_v11 }
 0x7d5   :  { %2231 = vmatprep.subr.bf16.mxu0 %v2415_v1 }
 0x7d7   :  { %2220 = vmatmul.mubr.msk.bf16.vlgmr.msra.gmra.mrb[20].mxu0 %vm254_vm4, %v2675_v0 }
 0x7d8   :  { %2233 = vmatprep.mubr.msk.bf16.mxu0 %vm2416_vm0, %v2415_v1  ;;  %2232 = vmatpush3.bf16.msra.mxu0 %v2372_v25 }
 0x7d9   :  { %2245 = vmatprep.subr.bf16.mxu0 %v2415_v1 }
 0x8aa   :  { %v2221_v19 = vpop.f32.mrb[20].mxu0 }
 0x8ab   :  { %v959_v35 = vadd.f32 %v2221_v19, %v2714_v32  ;;  %v950_v43 = vpop.f32.mrb[21].mxu0 }
 0x8ac   :  { %v951_v23 = vadd.f32 %v950_v43, %v2647_v28  ;;  %v2222_v21 = vpop.f32.mrb[22].mxu0 }
 0x8ad   :  { %v971_v33 = vmul.f32 0.01, %v959_v35  ;;  %v962_v56 = vadd.f32 %v2222_v21, %v2732_v59  ;;  %v953_v14 = vpop.f32.mrb[23].mxu0  ;;  %vm967_vm3 = vcmp.gt.f32.partialorder %v959_v35, 0.0  ;;  %v2370_v59 = vld [vmem:[%s3043_s5 + $0x30] sm:$0xff]  }
 0x8ae   :  { %v969_v53 = vmul.f32 0.01, %v951_v23  ;;  %v954_v20 = vadd.f32 %v953_v14, %v2663_v48  ;;  %vm965_vm5 = vcmp.gt.f32.partialorder %v951_v23, 0.0  ;;  %v2371_v48 = vld [vmem:[%s3043_s5 + $0x38] sm:$0xff]  }
 0x8af   :  { %vm968_vm6 = vcmp.gt.f32.partialorder %v962_v56, 0.0  ;;  %v972_v36 = vmul.f32 0.01, %v962_v56  ;;  %v975_v27 = vsel %vm967_vm3, %v959_v35, %v971_v33 }
 0x8b0   :  { %vm966_vm7 = vcmp.gt.f32.partialorder %v954_v20, 0.0  ;;  %v970_v46 = vmul.f32 0.01, %v954_v20  ;;  %v973_v32 = vsel %vm965_vm5, %v951_v23, %v969_v53 }
 0x8b1   :  { %v976_v31 = vsel %vm968_vm6, %v962_v56, %v972_v36 }
 0x8b2   :  { %v978_v47 = vpack.c.bf16 %v976_v31, %v975_v27  ;;  %v974_v54 = vsel %vm966_vm7, %v954_v20, %v970_v46 }
 0x8b3   :  { %v977_v28 = vpack.c.bf16 %v974_v54, %v973_v32 }
 0x8b5   :  { %2224 = vmatpush3.bf16.msra.mxu1 %v977_v28  ;;  %v2377_v28 = vld [vmem:[%s3043_s5 + $0x58] sm:$0xff]  }
 0x8b6   :  { %2225 = vmatprep.subr.bf16.mxu1 %v2415_v1 }
 0x8b9   :  { %2226 = vmatpush3.bf16.msra.mxu1 %v978_v47 }
 0x8ba   :  { %2237 = vmatprep.subr.bf16.mxu1 %v2415_v1 }
 0x8bc   :  { %2228 = vmatmul.mubr.msk.bf16.vlgmr.msra.gmra.mrb[24].mxu1 %vm85_vm1, %v2757_v17 }
 0x8bd   :  { %2238 = vmatpush3.bf16.msra.mxu1 %v2370_v59  ;;  %2241 = vmatprep.mubr.msk.bf16.mxu1 %vm2416_vm0, %v2415_v1 }
 0x8be   :  { %2239 = vmatprep.subr.bf16.mxu1 %v2415_v1 }
 0x8c1   :  { %2240 = vmatpush3.bf16.msra.mxu1 %v2371_v48 }
 0x8c4   :  { %2242 = vmatmul.mubr.msk.bf16.vlgmr.msra.gmra.mrb[28].mxu1 %vm85_vm1, %v810_v12 }
 0x8c5   :  { %2255 = vmatprep.mubr.msk.bf16.mxu1 %vm254_vm4, %v2557_v39 }
 0x98f   :  { %v1013_v30 = vpop.f32.mrb[24].mxu1 }
 0x990   :  { %v2229_v22 = vpop.f32.mrb[25].mxu1  ;;  %v1020_v63 = vmul.f32 %v2799_v45, %v1013_v30 }
 0x991   :  { %v1016_v7 = vpop.f32.mrb[26].mxu1 }
 0x992   :  { %v1021_v42 = vmul.f32 %v2801_v52, %v1016_v7  ;;  %v2230_v41 = vpop.f32.mrb[27].mxu1 }
 0x994   :  { %v1022_v55 = vpack.c.bf16 %v1021_v42, %v1020_v63 }
 0x996   :  { %2234 = vmatmul.mubr.msk.bf16.vlgmr.msra.gmra.mrb[24].mxu0 %vm254_vm4, %v1022_v55 }
 0x997   :  { %v1119_v58 = vpop.f32.mrb[28].mxu1  ;;  %2249 = vmatprep.mubr.msk.bf16.mxu0 %vm2416_vm0, %v2415_v1  ;;  %2246 = vmatpush3.bf16.msra.mxu0 %v2373_v62 }
 0x998   :  { %v2243_v26 = vpop.f32.mrb[29].mxu1  ;;  %2247 = vmatprep.subr.bf16.mxu0 %v2415_v1 }
 0x999   :  { %v1122_v60 = vpop.f32.mrb[30].mxu1  ;;  %v2379_v26 = vld [vmem:[%s3041_s3 + $0x48] sm:$0xff]  }
 0x99a   :  { %v2244_v34 = vpop.f32.mrb[31].mxu1 }
 0x99b   :  { %2248 = vmatpush3.bf16.msra.mxu0 %v2374_v44 }
 0x99c   :  { %2259 = vmatprep.subr.bf16.mxu0 %v2415_v1 }
 0xa69   :  { %v1066_v57 = vpop.f32.mrb[24].mxu0 }
 0xa6a   :  { %v1120_v4 = vadd.f32 %v1119_v58, %v1066_v57  ;;  %v2235_v6 = vpop.f32.mrb[25].mxu0  ;;  %v2378_v58 = vld [vmem:[%s3041_s3 + $0x40] sm:$0xff]  }
 0xa6b   :  { %v1069_v2 = vpop.f32.mrb[26].mxu0 }
 0xa6c   :  { %v1132_v51 = vadd.f32 %v2004_v37, %v1120_v4  ;;  %v1123_v15 = vadd.f32 %v1122_v60, %v1069_v2  ;;  %v2236_v5 = vpop.f32.mrb[27].mxu0  ;;  %v2028_v60 = vld [vmem:[%s3044_s6 + $0x3] ss:$0 sm:$0xff] }
 0xa6e   :  { %v1133_v3 = vadd.f32 %v2004_v37, %v1123_v15  ;;  %v1134_v24 = vmax.f32 %v1132_v51, 0.0 }
 0xa70   :  { %v1135_v12 = vmax.f32 %v1133_v3, 0.0 }
 0xa72   :  { %v1136_v16 = vpack.c.bf16 %v1135_v12, %v1134_v24 }
 0xa74   :  { %2250 = vmatmul.mubr.msk.bf16.vlgmr.msra.gmra.mrb[28].mxu0 %vm85_vm1, %v1136_v16 }
 0xa75   :  { %2263 = vmatprep.mubr.msk.bf16.mxu0 %vm2416_vm0, %v2415_v1 }
 0xb47   :  { %v1202_v40 = vpop.f32.mrb[28].mxu0 }
 0xb48   :  { %v2251_v61 = vpop.f32.mrb[29].mxu0 }
 0xb49   :  { %v1205_v11 = vpop.f32.mrb[30].mxu0 }
 0xb4a   :  { %v1241_v18 = vpack.c.bf16 %v1205_v11, %v1202_v40  ;;  %v2252_v19 = vpop.f32.mrb[31].mxu0 }
 0xb4c   :  { %2253 = vmatprep.subr.bf16.mxu1 %v1241_v18 }
 0xb4d   :  { %2254 = vmatpush3.bf16.msra.mxu1 %v1241_v18 }
 0xb4e   :  { %2267 = vmatprep.subr.bf16.mxu1 %v2415_v1 }
 0xb50   :  { %2256 = vmatmul.mubr.msk.bf16.vlgmr.msra.gmra.mrb[32].mxu1 %vm254_vm4, %v2675_v0 }
 0xb51   :  { %2269 = vmatprep.mubr.msk.bf16.mxu1 %vm2416_vm0, %v2415_v1  ;;  %2268 = vmatpush3.bf16.msra.mxu1 %v2377_v28 }
 0xb52   :  { %2281 = vmatprep.subr.bf16.mxu1 %v2415_v1 }
 0xc23   :  { %v2257_v35 = vpop.f32.mrb[32].mxu1 }
 0xc24   :  { %v1285_v43 = vadd.f32 %v2257_v35, %v2742_v8  ;;  %v1276_v23 = vpop.f32.mrb[33].mxu1 }
 0xc25   :  { %v1277_v21 = vadd.f32 %v1276_v23, %v2649_v29  ;;  %v2258_v33 = vpop.f32.mrb[34].mxu1 }
 0xc26   :  { %v1297_v56 = vmul.f32 0.01, %v1285_v43  ;;  %v1288_v14 = vadd.f32 %v2258_v33, %v2744_v9  ;;  %v1279_v53 = vpop.f32.mrb[35].mxu1  ;;  %vm1293_vm8 = vcmp.gt.f32.partialorder %v1285_v43, 0.0  ;;  %v2375_v9 = vld [vmem:[%s3043_s5 + $0x48] sm:$0xff]  }
 0xc27   :  { %v1295_v20 = vmul.f32 0.01, %v1277_v21  ;;  %v1280_v36 = vadd.f32 %v1279_v53, %v2665_v49  ;;  %vm1291_vm9 = vcmp.gt.f32.partialorder %v1277_v21, 0.0  ;;  %v2376_v49 = vld [vmem:[%s3043_s5 + $0x50] sm:$0xff]  }
 0xc28   :  { %vm1294_vm10 = vcmp.gt.f32.partialorder %v1288_v14, 0.0  ;;  %v1298_v46 = vmul.f32 0.01, %v1288_v14  ;;  %v1301_v31 = vsel %vm1293_vm8, %v1285_v43, %v1297_v56 }
 0xc29   :  { %vm1292_vm11 = vcmp.gt.f32.partialorder %v1280_v36, 0.0  ;;  %v1296_v27 = vmul.f32 0.01, %v1280_v36  ;;  %v1299_v8 = vsel %vm1291_vm9, %v1277_v21, %v1295_v20 }
 0xc2a   :  { %v1302_v32 = vsel %vm1294_vm10, %v1288_v14, %v1298_v46 }
 0xc2b   :  { %v1304_v47 = vpack.c.bf16 %v1302_v32, %v1301_v31  ;;  %v1300_v54 = vsel %vm1292_vm11, %v1280_v36, %v1296_v27 }
 0xc2c   :  { %v1303_v29 = vpack.c.bf16 %v1300_v54, %v1299_v8 }
 0xc2e   :  { %2260 = vmatpush3.bf16.msra.mxu0 %v1303_v29 }
 0xc2f   :  { %2261 = vmatprep.subr.bf16.mxu0 %v2415_v1 }
 0xc32   :  { %2262 = vmatpush3.bf16.msra.mxu0 %v1304_v47 }
 0xc33   :  { %2273 = vmatprep.subr.bf16.mxu0 %v2415_v1 }
 0xc35   :  { %2264 = vmatmul.mubr.msk.bf16.vlgmr.msra.gmra.mrb[32].mxu0 %vm85_vm1, %v2757_v17 }
 0xc36   :  { %2274 = vmatpush3.bf16.msra.mxu0 %v2375_v9  ;;  %2277 = vmatprep.mubr.msk.bf16.mxu0 %vm2416_vm0, %v2415_v1 }
 0xc37   :  { %2275 = vmatprep.subr.bf16.mxu0 %v2415_v1 }
 0xc3a   :  { %2276 = vmatpush3.bf16.msra.mxu0 %v2376_v49 }
 0xc3d   :  { %2278 = vmatmul.mubr.msk.bf16.vlgmr.msra.gmra.mrb[36].mxu0 %vm85_vm1, %v1136_v16 }
 0xc3e   :  { %2291 = vmatprep.mubr.msk.bf16.mxu0 %vm254_vm4, %v2557_v39 }
 0xd08   :  { %v1339_v59 = vpop.f32.mrb[32].mxu0 }
 0xd09   :  { %v2265_v48 = vpop.f32.mrb[33].mxu0  ;;  %v1346_v30 = vmul.f32 %v2799_v45, %v1339_v59 }
 0xd0a   :  { %v1342_v25 = vpop.f32.mrb[34].mxu0  ;;  %v2383_v48 = vld [vmem:[%s3045_s7] sm:$0xff]  }
 0xd0b   :  { %v1347_v22 = vmul.f32 %v2801_v52, %v1342_v25  ;;  %v2266_v7 = vpop.f32.mrb[35].mxu0 }
 0xd0d   :  { %v1348_v63 = vpack.c.bf16 %v1347_v22, %v1346_v30 }
 0xd0f   :  { %2270 = vmatmul.mubr.msk.bf16.vlgmr.msra.gmra.mrb[36].mxu1 %vm254_vm4, %v1348_v63 }
 0xd10   :  { %v1445_v42 = vpop.f32.mrb[36].mxu0  ;;  %2285 = vmatprep.mubr.msk.bf16.mxu1 %vm2416_vm0, %v2415_v1  ;;  %2282 = vmatpush3.bf16.msra.mxu1 %v2378_v58 }
 0xd11   :  { %v2279_v39 = vpop.f32.mrb[37].mxu0  ;;  %2283 = vmatprep.subr.bf16.mxu1 %v2415_v1 }
 0xd12   :  { %v1448_v41 = vpop.f32.mrb[38].mxu0 }
 0xd13   :  { %v2280_v55 = vpop.f32.mrb[39].mxu0 }
 0xd14   :  { %2284 = vmatpush3.bf16.msra.mxu1 %v2379_v26 }
 0xd15   :  { %2295 = vmatprep.subr.bf16.mxu1 %v2415_v1 }
 0xde2   :  { %v1392_v34 = vpop.f32.mrb[36].mxu1 }
 0xde3   :  { %v1446_v62 = vadd.f32 %v1445_v42, %v1392_v34  ;;  %v2271_v44 = vpop.f32.mrb[37].mxu1  ;;  %v2386_v34 = vld [vmem:[%s3047_s9 + $0x8] sm:$0xff]  }
 0xde4   :  { %v1395_v37 = vpop.f32.mrb[38].mxu1 }
 0xde5   :  { %v1458_v57 = vadd.f32 %v2028_v60, %v1446_v62  ;;  %v1449_v4 = vadd.f32 %v1448_v41, %v1395_v37  ;;  %v2272_v6 = vpop.f32.mrb[39].mxu1  ;;  %v2053_v62 = vld [vmem:[%s3046_s8] ss:$0 sm:$0xff] }
 0xde7   :  { %v1459_v2 = vadd.f32 %v2028_v60, %v1449_v4  ;;  %v1460_v51 = vmax.f32 %v1458_v57, 0.0  ;;  %v2385_v60 = vld [vmem:[%s3047_s9] sm:$0xff]   ;;  %s2420_s9 = smov [#allocation2]  }
 0xde8   :  { %s1933_s19 = sshll.u32 %s2420_s9, 4  ;;  %s1934_s19 = int_to_ptr.vmem [resolvable:$true] %s1933_s19 }
 0xde9   :  { %v1461_v15 = vmax.f32 %v1459_v2, 0.0  ;;  %s2391_s8 = scalar_lea.vmem %s1934_s19, 256  ;;  %p2396_p1 = scmp.lt.s32.totalorder %s1934_s19, %s1934_s19 }
 0xdea   :  { %p2392_p0 = scmp.ne.s32.totalorder %s1934_s19, %s2391_s8  ;;  %p2397_p2 = scmp.lt.s32.totalorder %s2391_s8, %s2391_s8 }
 0xdeb   :  { %v1462_v5 = vpack.c.bf16 %v1461_v15, %v1460_v51 }
 0xdec   :  { %p2398_p3 = por %p2397_p2, %p2396_p1 }
 0xded   :  { %2286 = vmatmul.mubr.msk.bf16.vlgmr.msra.gmra.mrb[40].mxu1 %vm85_vm1, %v1462_v5 }
 0xdee   :  { %2299 = vmatprep.mubr.msk.bf16.mxu1 %vm2416_vm0, %v2415_v1  ;;  %p2399_p4 = pnand %p2398_p3, %p2392_p0 }
 0xec0   :  { %v1528_v3 = vpop.f32.mrb[40].mxu1 }
 0xec1   :  { %v2287_v24 = vpop.f32.mrb[41].mxu1 }
 0xec2   :  { %v1531_v12 = vpop.f32.mrb[42].mxu1 }
 0xec3   :  { %v1567_v16 = vpack.c.bf16 %v1531_v12, %v1528_v3  ;;  %v2288_v40 = vpop.f32.mrb[43].mxu1 }
 0xec5   :  { %2289 = vmatprep.subr.bf16.mxu0 %v1567_v16 }
 0xec6   :  { %2290 = vmatpush3.bf16.msra.mxu0 %v1567_v16 }
 0xec7   :  { %2303 = vmatprep.subr.bf16.mxu0 %v2415_v1 }
 0xec9   :  { %2292 = vmatmul.mubr.msk.bf16.vlgmr.msra.gmra.mrb[40].mxu0 %vm254_vm4, %v2675_v0 }
 0xeca   :  { %2305 = vmatprep.mubr.msk.bf16.mxu0 %vm2416_vm0, %v2415_v1 }
 0xf9c   :  { %v2293_v61 = vpop.f32.mrb[40].mxu0 }
 0xf9d   :  { %v1611_v11 = vadd.f32 %v2293_v61, %v2746_v10  ;;  %v1602_v18 = vpop.f32.mrb[41].mxu0 }
 0xf9e   :  { %v1603_v19 = vadd.f32 %v1602_v18, %v2657_v38  ;;  %v2294_v35 = vpop.f32.mrb[42].mxu0 }
 0xf9f   :  { %v1623_v43 = vmul.f32 0.01, %v1611_v11  ;;  %v1614_v23 = vadd.f32 %v2294_v35, %v2748_v13  ;;  %v1605_v21 = vpop.f32.mrb[43].mxu0  ;;  %vm1619_vm12 = vcmp.gt.f32.partialorder %v1611_v11, 0.0  ;;  %v2380_v13 = vld [vmem:[%s3043_s5 + $0x60] sm:$0xff]  }
 0xfa0   :  { %v1621_v33 = vmul.f32 0.01, %v1603_v19  ;;  %v1606_v56 = vadd.f32 %v1605_v21, %v2667_v50  ;;  %vm1617_vm13 = vcmp.gt.f32.partialorder %v1603_v19, 0.0  ;;  %v2381_v50 = vld [vmem:[%s3043_s5 + $0x68] sm:$0xff]  }
 0xfa1   :  { %vm1620_vm14 = vcmp.gt.f32.partialorder %v1614_v23, 0.0  ;;  %v1624_v0 = vmul.f32 0.01, %v1614_v23  ;;  %v1627_v53 = vsel %vm1619_vm12, %v1611_v11, %v1623_v43 }
 0xfa2   :  { %vm1618_vm15 = vcmp.gt.f32.partialorder %v1606_v56, 0.0  ;;  %v1622_v14 = vmul.f32 0.01, %v1606_v56  ;;  %v1625_v10 = vsel %vm1617_vm13, %v1603_v19, %v1621_v33 }
 0xfa3   :  { %v1628_v20 = vsel %vm1620_vm14, %v1614_v23, %v1624_v0 }
 0xfa4   :  { %v1630_v36 = vpack.c.bf16 %v1628_v20, %v1627_v53  ;;  %v1626_v46 = vsel %vm1618_vm15, %v1606_v56, %v1622_v14 }
 0xfa5   :  { %v1629_v38 = vpack.c.bf16 %v1626_v46, %v1625_v10 }
 0xfa7   :  { %2296 = vmatpush3.bf16.msra.mxu1 %v1629_v38 }
 0xfa8   :  { %2297 = vmatprep.subr.bf16.mxu1 %v2415_v1 }
 0xfab   :  { %2298 = vmatpush3.bf16.msra.mxu1 %v1630_v36 }
 0xfac   :  { %2309 = vmatprep.subr.bf16.mxu1 %v2415_v1 }
 0xfae   :  { %2300 = vmatmul.mubr.msk.bf16.vlgmr.msra.gmra.mrb[44].mxu1 %vm85_vm1, %v2757_v17  ;;  %v2382_v17 = vld [vmem:[%s3043_s5 + $0x70] sm:$0xff]  }
 0xfaf   :  { %2310 = vmatpush3.bf16.msra.mxu1 %v2380_v13  ;;  %2313 = vmatprep.mubr.msk.bf16.mxu1 %vm2416_vm0, %v2415_v1 }
 0xfb0   :  { %2311 = vmatprep.subr.bf16.mxu1 %v2415_v1  ;;  %2304 = vmatpush3.bf16.msra.mxu0 %v2382_v17 }
 0xfb1   :  { %2317 = vmatprep.subr.bf16.mxu0 %v2415_v1 }
 0xfb3   :  { %2312 = vmatpush3.bf16.msra.mxu1 %v2381_v50 }
 0xfb4   :  { %2325 = vmatprep.subr.bf16.mxu1 %v2415_v1 }
 0xfb6   :  { %2314 = vmatmul.mubr.msk.bf16.vlgmr.msra.gmra.mrb[48].mxu1 %vm85_vm1, %v1462_v5 }
 0xfb7   :  { %2329 = vmatprep.mubr.msk.bf16.mxu1 %vm2416_vm0, %v2415_v1  ;;  %2326 = vmatpush3.bf16.msra.mxu1 %v2385_v60 }
 0xfb8   :  { %2327 = vmatprep.subr.bf16.mxu1 %v2415_v1 }
 0xfbb   :  { %2328 = vmatpush3.bf16.msra.mxu1 %v2386_v34 }
0x1081   :  { %v1665_v27 = vpop.f32.mrb[44].mxu1 }
0x1082   :  { %v2301_v31 = vpop.f32.mrb[45].mxu1  ;;  %v1672_v8 = vmul.f32 %v2799_v45, %v1665_v27  ;;  %v2384_v45 = vld [vmem:[%s3045_s7 + $0x8] sm:$0xff]  }
0x1083   :  { %v1668_v32 = vpop.f32.mrb[46].mxu1 }
0x1084   :  { %v1673_v47 = vmul.f32 %v2801_v52, %v1668_v32  ;;  %v2302_v54 = vpop.f32.mrb[47].mxu1  ;;  %v2052_v52 = vld [vmem:[%s3044_s6 + $0x4] ss:$0 sm:$0xff] }
0x1086   :  { %v1674_v29 = vpack.c.bf16 %v1673_v47, %v1672_v8 }
0x1088   :  { %2306 = vmatmul.mubr.msk.bf16.vlgmr.msra.gmra.mrb[44].mxu0 %vm254_vm4, %v1674_v29 }
0x1089   :  { %v1771_v9 = vpop.f32.mrb[48].mxu1  ;;  %2321 = vmatprep.mubr.msk.bf16.mxu0 %vm2416_vm0, %v2415_v1  ;;  %2318 = vmatpush3.bf16.msra.mxu0 %v2383_v48 }
0x108a   :  { %v2315_v49 = vpop.f32.mrb[49].mxu1  ;;  %2319 = vmatprep.subr.bf16.mxu0 %v2415_v1  ;;  %v2057_v1 = vld [vmem:[%s3048_s10] ss:$0 sm:$0xff] }
0x108b   :  { %v1774_v28 = vpop.f32.mrb[50].mxu1 }
0x108c   :  { %v2316_v59 = vpop.f32.mrb[51].mxu1 }
0x108d   :  { %2320 = vmatpush3.bf16.msra.mxu0 %v2384_v45 }
0x115b   :  { %v1718_v25 = vpop.f32.mrb[44].mxu0 }
0x115c   :  { %v1772_v30 = vadd.f32 %v1771_v9, %v1718_v25  ;;  %v2307_v22 = vpop.f32.mrb[45].mxu0 }
0x115d   :  { %v1721_v7 = vpop.f32.mrb[46].mxu0 }
0x115e   :  { %v1784_v63 = vadd.f32 %v2052_v52, %v1772_v30  ;;  %v1775_v42 = vadd.f32 %v1774_v28, %v1721_v7  ;;  %v2308_v39 = vpop.f32.mrb[47].mxu0 }
0x1160   :  { %v1785_v41 = vadd.f32 %v2052_v52, %v1775_v42  ;;  %v1786_v55 = vmax.f32 %v1784_v63, 0.0 }
0x1162   :  { %v1787_v58 = vmax.f32 %v1785_v41, 0.0 }
0x1164   :  { %v1788_v26 = vpack.c.bf16 %v1787_v58, %v1786_v55 }
0x1166   :  { %2322 = vmatmul.mubr.msk.bf16.vlgmr.msra.gmra.mrb[48].mxu0 %vm85_vm1, %v1788_v26 }
0x1239   :  { %v1849_v44 = vpop.f32.mrb[48].mxu0 }
0x123a   :  { %v1850_v37 = vadd.f32 %v2053_v62, %v1849_v44  ;;  %v2323_v57 = vpop.f32.mrb[49].mxu0 }
0x123b   :  { %v1852_v4 = vpop.f32.mrb[50].mxu0 }
0x123c   :  { %v1853_v6 = vadd.f32 %v2053_v62, %v1852_v4  ;;  %v2324_v2 = vpop.f32.mrb[51].mxu0  ;;  %v1856_v51 = vmax.f32 %v1850_v37, 0.0 }
0x123e   :  { %v1857_v15 = vmax.f32 %v1853_v6, 0.0 }
0x1240   :  { %v1858_v5 = vpack.c.bf16 %v1857_v15, %v1856_v51 }
0x1242   :  { %2330 = vmatmul.mubr.msk.bf16.vlgmr.msra.gmra.mrb[52].mxu1 %vm85_vm1, %v1858_v5 }
0x1315   :  { %v1919_v3 = vpop.f32.mrb[52].mxu1 }
0x1316   :  { %v1920_v24 = vadd.f32 %v2057_v1, %v1919_v3  ;;  %v2331_v12 = vpop.f32.mrb[53].mxu1 }
0x1317   :  { %v1922_v16 = vpop.f32.mrb[54].mxu1 }
0x1318   :  { %1926 = vst [vmem:[#allocation2] sm:$0xff] %v1920_v24  ;;  %v1923_v40 = vadd.f32 %v2057_v1, %v1922_v16  ;;  %v2332_v61 = vpop.f32.mrb[55].mxu1 }
0x131a   :  { %1927 = vst [vmem:[#allocation2 + $0x8] sm:$0xff] %v1923_v40 }
0x131b   :  { %2402 = shalt.err (!%p2399_p4)
}
0x131c   :  { %s2403_s21 = scalar_lea.hbm %s3049_s11, 256 }
0x131d   :  { %p2404_p5 = scmp.ne.s32.totalorder %s3049_s11, %s2403_s21  ;;  %p2407_p6 = scmp.lt.u32.totalorder %s2403_s21, %s3049_s11 }
0x131f   :  { %p2409_p7 = pnand %p2407_p6, %p2404_p5 }
0x1321   :  { %2412 = shalt.err (!%p2409_p7)
}
0x1322   :  { %s2421_s3 = smov 128   ;;  %s2422_s24 = smov 8  }
0x1323   :  { %1939 = dma.vmem_to_hbm [thread:$0]  %s1934_s19, 256, %s3049_s11, [#allocation3], %s2421_s3, %s2421_s3, %s2422_s24  }
0x1324   :  { %2413 = dma.done.wait [#allocation3], 256  }
0x1325   :  { %2414 = vsyncadd [#allocation3], 4294967040 }
0x1326   :  { %1943 = vsyncpa [#allocation3], 1 }

</bundles_post_ra>
